<compile_context>
chip_gen: v7x
topology: tpu7x:2x2x1
jax: 0.10.0
libtpu: 0.0.40
codegen_flags: <defaults>
</compile_context>

<pallas_src>
import math

import jax
import jax.numpy as jnp
from jax import lax
from jax.experimental import pallas as pl
from jax.experimental.pallas import tpu as pltpu

# ----------------------------- synthetic config ------------------------------
VOCAB = 64            # len_tokenizer
H_REAL = 32           # config.hidden_size (TinyBERT real = 312; small synthetic value)
NUM_HEADS = 2
HEAD_DIM = H_REAL // NUM_HEADS
I_REAL = 64           # intermediate size
NUM_LAYERS = 2        # TinyBERT 4L -> 2 layers for the small synthetic model
MAX_POS = 16
PROJ_REAL = 32        # self.proj
TEMPERATURE = 0.07
BASE_TEMPERATURE = 0.07
LN_EPS = 1e-12

BATCH = 2
SEQ = 8

# lane padding: keep the last (lane) dim of activations / weights at 128.
LANE = 128
H_PAD = LANE
I_PAD = LANE
P_PAD = LANE


# ----------------------------- small helpers ---------------------------------
def _lane_mask(shape, n_real, dtype=jnp.float32):
    return (lax.broadcasted_iota(jnp.int32, shape, len(shape) - 1) < n_real).astype(dtype)


def _masked_layer_norm(y, g, b):
    # y: (..., H_PAD) f32, lanes >= H_REAL are exactly zero; g/b zero-padded.
    mask = _lane_mask(y.shape, H_REAL, y.dtype)
    mu = jnp.sum(y, axis=-1, keepdims=True) * (1.0 / H_REAL)
    var = jnp.sum(jnp.square((y - mu) * mask), axis=-1, keepdims=True) * (1.0 / H_REAL)
    return (y - mu) * lax.rsqrt(var + LN_EPS) * g + b


def _gelu_tanh(x):
    # TODO(synk): HF BERT default is exact erf GELU; tanh approximation kept here.
    c = math.sqrt(2.0 / math.pi)
    return 0.5 * x * (1.0 + jnp.tanh(c * (x + 0.044715 * x * x * x)))


# ------------------- kernel 1: fused multi-layer BERT encoder ----------------
def encoder_kernel(x_ref, bias_ref, embg_ref, embb_ref,
                   wqkv_ref, bqkv_ref, wo_ref, bo_ref,
                   ln1g_ref, ln1b_ref, w1_ref, b1_ref, w2_ref, b2_ref,
                   ln2g_ref, ln2b_ref, out_ref):
    layer = pl.program_id(1)
    bB, S, HP = out_ref.shape
    T = bB * S
    hd = HEAD_DIM
    scale = 1.0 / math.sqrt(hd)

    # Layer 0: fold the embedding LayerNorm in and seed the resident activation.
    @pl.when(layer == 0)
    def _():
        x0 = x_ref[...].reshape(T, HP)
        out_ref[...] = _masked_layer_norm(
            x0, embg_ref[...], embb_ref[...]).reshape(bB, S, HP)

    x2 = out_ref[...].reshape(T, HP)                 # resident activation, f32
    xb = x2.astype(jnp.bfloat16)

    # Fused QKV projection: one (T,HP) x (HP,3HP) matmul; 128-aligned lane slices.
    qkv = jnp.dot(xb, wqkv_ref[...],
                  preferred_element_type=jnp.float32) + bqkv_ref[...]
    q = qkv[:, 0 * HP:1 * HP].reshape(bB, S, HP)
    k = qkv[:, 1 * HP:2 * HP].reshape(bB, S, HP)
    v = qkv[:, 2 * HP:3 * HP].reshape(bB, S, HP)

    bias = bias_ref[...]                             # (bB, 1, S) additive key mask

    # Multi-head attention; head outputs are folded straight into the output
    # projection (no lane-axis concatenate).  NUM_HEADS is tiny, loop unrolls.
    # TODO(synk): at real TinyBERT sizes heads would go on the grid instead of
    # this unrolled loop over 16-wide head slices.
    attn_out = bo_ref[...]                           # (1, HP) -> broadcasts over T
    for h in range(NUM_HEADS):
        sl = slice(h * hd, (h + 1) * hd)
        qh = q[:, :, sl].astype(jnp.bfloat16)
        kh = k[:, :, sl].astype(jnp.bfloat16)
        vh = v[:, :, sl].astype(jnp.bfloat16)
        s = jnp.einsum('bqd,bkd->bqk', qh, kh,
                       preferred_element_type=jnp.float32) * scale
        s = s + bias
        s = s - jnp.max(s, axis=-1, keepdims=True)
        p = jnp.exp(s)
        p = p * pl.reciprocal(jnp.sum(p, axis=-1, keepdims=True), approx=True)
        ctx = jnp.einsum('bqk,bkd->bqd', p.astype(jnp.bfloat16), vh,
                         preferred_element_type=jnp.float32)
        attn_out = attn_out + jnp.dot(
            ctx.reshape(T, hd).astype(jnp.bfloat16), wo_ref[sl, :],
            preferred_element_type=jnp.float32)

    x1 = _masked_layer_norm(x2 + attn_out, ln1g_ref[...], ln1b_ref[...])

    h1 = jnp.dot(x1.astype(jnp.bfloat16), w1_ref[...],
                 preferred_element_type=jnp.float32) + b1_ref[...]
    h1 = _gelu_tanh(h1)
    h2 = jnp.dot(h1.astype(jnp.bfloat16), w2_ref[...],
                 preferred_element_type=jnp.float32) + b2_ref[...]

    y = _masked_layer_norm(x1 + h2, ln2g_ref[...], ln2b_ref[...])
    out_ref[...] = y.reshape(bB, S, HP)


def fused_encoder(x, attn_bias, params, *, batch_block=2):
    N, S, HP = x.shape
    bB = min(batch_block, N)
    assert N % bB == 0
    grid = (N // bB, NUM_LAYERS)

    def act_map(b, l):
        return (b, 0, 0)

    def w_map(b, l):
        return (l, 0, 0)

    def const_map(b, l):
        return (0, 0)

    in_specs = [
        pl.BlockSpec((bB, S, HP), act_map),           # x (post-embedding, f32)
        pl.BlockSpec((bB, 1, S), act_map),            # additive key mask
        pl.BlockSpec((1, HP), const_map),             # emb LN gamma
        pl.BlockSpec((1, HP), const_map),             # emb LN beta
        pl.BlockSpec((None, HP, 3 * HP), w_map),      # wqkv (bf16)
        pl.BlockSpec((None, 1, 3 * HP), w_map),       # bqkv
        pl.BlockSpec((None, HP, HP), w_map),          # wo (bf16)
        pl.BlockSpec((None, 1, HP), w_map),           # bo
        pl.BlockSpec((None, 1, HP), w_map),           # ln1 gamma
        pl.BlockSpec((None, 1, HP), w_map),           # ln1 beta
        pl.BlockSpec((None, HP, I_PAD), w_map),       # w1 (bf16)
        pl.BlockSpec((None, 1, I_PAD), w_map),        # b1
        pl.BlockSpec((None, I_PAD, HP), w_map),       # w2 (bf16)
        pl.BlockSpec((None, 1, HP), w_map),           # b2
        pl.BlockSpec((None, 1, HP), w_map),           # ln2 gamma
        pl.BlockSpec((None, 1, HP), w_map),           # ln2 beta
    ]
    out_spec = pl.BlockSpec((bB, S, HP), act_map)     # same block across layer axis

    return pl.pallas_call(
        encoder_kernel,
        out_shape=jax.ShapeDtypeStruct((N, S, HP), jnp.float32),
        grid=grid,
        in_specs=in_specs,
        out_specs=out_spec,
        compiler_params=pltpu.CompilerParams(
            dimension_semantics=("parallel", "arbitrary"),
            vmem_limit_bytes=32 * 1024 * 1024),
    )(x, attn_bias,
      params['emb_ln_g'], params['emb_ln_b'],
      params['wqkv'], params['bqkv'], params['wo'], params['bo'],
      params['ln1_g'], params['ln1_b'], params['w1'], params['b1'],
      params['w2'], params['b2'], params['ln2_g'], params['ln2_b'])


# ---------- kernel 2: mean-pool + proj + tanh + normalize + SupConLoss --------
def pool_proj_supcon_kernel(hid_ref, mask_ref, lab_row_ref, lab_col_ref,
                            w_ref, b_ref, loss_ref):
    hid = hid_ref[...]                                # (Nv, S, H_PAD) f32
    m = mask_ref[...]                                 # (Nv, S, 1) f32

    # mean_pooling
    summed = jnp.sum(hid * m, axis=1)                 # (Nv, H_PAD)
    cnt = jnp.maximum(jnp.sum(m, axis=1), 1e-9)       # (Nv, 1)  == torch.clamp(min=1e-9)
    pooled = summed * pl.reciprocal(cnt, approx=True)

    # tanh(Linear) + F.normalize(dim=-1)
    z = jnp.tanh(jnp.dot(pooled.astype(jnp.bfloat16), w_ref[...],
                         preferred_element_type=jnp.float32) + b_ref[...])
    inv_norm = lax.rsqrt(jnp.maximum(jnp.sum(z * z, axis=-1, keepdims=True), 1e-24))
    feats = z * inv_norm                              # (Nv, P_PAD), padded lanes = 0

    # SupConLoss (all-views anchor mode, base_temperature == temperature)
    n = feats.shape[0]
    fb = feats.astype(jnp.bfloat16)
    logits = jnp.einsum('id,jd->ij', fb, fb,
                        preferred_element_type=jnp.float32) * (1.0 / TEMPERATURE)
    logits = logits - jnp.max(logits, axis=1, keepdims=True)

    row = lax.broadcasted_iota(jnp.int32, (n, n), 0)
    col = lax.broadcasted_iota(jnp.int32, (n, n), 1)
    logits_mask = (row != col).astype(jnp.float32)                        # 1 - eye(n)
    pos_mask = (lab_col_ref[...] == lab_row_ref[...]).astype(jnp.float32) * logits_mask

    exp_logits = jnp.exp(logits) * logits_mask
    log_prob = logits - jnp.log(jnp.sum(exp_logits, axis=1, keepdims=True))
    denom = jnp.maximum(jnp.sum(pos_mask, axis=1, keepdims=True), 1.0)    # 0-positive guard
    mean_log_prob_pos = jnp.sum(pos_mask * log_prob, axis=1, keepdims=True) / denom
    loss = -(TEMPERATURE / BASE_TEMPERATURE) * mean_log_prob_pos          # (Nv, 1)
    loss_ref[...] = jnp.mean(loss, keepdims=True)


def pool_proj_supcon(hidden, token_mask, lab_row, lab_col, proj_w, proj_b):
    # Small batch-coupled epilogue -> single whole-array invocation.
    vmem = lambda: pl.BlockSpec(memory_space=pltpu.MemorySpace.VMEM)
    out = pl.pallas_call(
        pool_proj_supcon_kernel,
        out_shape=jax.ShapeDtypeStruct((1, 1), jnp.float32),
        in_specs=[vmem() for _ in range(6)],
        out_specs=vmem(),
    )(hidden, token_mask, lab_row, lab_col, proj_w, proj_b)
    return out[0, 0]


# ----------------------------- full forward -----------------------------------
def contrastive_pretrain_forward(params, input_ids, attention_mask, labels,
                                 input_ids_right, attention_mask_right):
    # Both views share one encoder pass: stack along batch so weights are DMA'd
    # once and the grid gets a parallel batch axis.
    ids = jnp.concatenate([input_ids, input_ids_right], axis=0)            # (2B, S)
    amask = jnp.concatenate([attention_mask, attention_mask_right], axis=0)
    mask_f = amask.astype(jnp.float32)

    # Embedding gather stays in plain JAX; the embedding LayerNorm is fused into
    # the encoder kernel at layer 0.
    x = jnp.take(params['word_emb'], ids, axis=0) \
        + params['pos_emb'][None, :ids.shape[1], :]                        # (2B, S, H_PAD)
    attn_bias = ((1.0 - mask_f) * -1e9)[:, None, :]                        # (2B, 1, S)

    hidden = fused_encoder(x, attn_bias, params)                           # (2B, S, H_PAD)

    # SupCon contrast order = [left_0..left_{B-1}, right_0..right_{B-1}]  (matches
    # torch.cat(unbind(features, dim=1), dim=0)).
    labels2 = jnp.concatenate([labels, labels], axis=0).astype(jnp.int32)  # (2B,)
    loss = pool_proj_supcon(hidden, mask_f[:, :, None],
                            labels2[None, :], labels2[:, None],
                            params['proj_w'], params['proj_b'])
    return (loss,)


# ----------------------------- parameter init ---------------------------------
def _pad2(a, rows, cols):
    out = jnp.zeros((rows, cols), a.dtype)
    return out.at[:a.shape[0], :a.shape[1]].set(a)


def _pad_row(v, cols):
    out = jnp.zeros((1, cols), v.dtype)
    return out.at[0, :v.shape[0]].set(v)


def init_params(key):
    def nrm(k, shape, scale=0.02):
        return scale * jax.random.normal(k, shape, jnp.float32)

    keys = jax.random.split(key, 4 + NUM_LAYERS)
    params = {
        'word_emb': _pad2(nrm(keys[0], (VOCAB, H_REAL)), VOCAB, H_PAD),
        'pos_emb': _pad2(nrm(keys[1], (MAX_POS, H_REAL)), MAX_POS, H_PAD),
        'emb_ln_g': _pad_row(jnp.ones((H_REAL,), jnp.float32), H_PAD),
        'emb_ln_b': _pad_row(jnp.zeros((H_REAL,), jnp.float32), H_PAD),
        'proj_w': _pad2(nrm(keys[2], (H_REAL, PROJ_REAL)), H_PAD, P_PAD).astype(jnp.bfloat16),
        'proj_b': _pad_row(jnp.zeros((PROJ_REAL,), jnp.float32), P_PAD),
    }

    wqkv, bqkv, wo, bo = [], [], [], []
    ln1g, ln1b, w1, b1, w2, b2, ln2g, ln2b = [], [], [], [], [], [], [], []
    for li in range(NUM_LAYERS):
        lk = jax.random.split(keys[4 + li], 6)
        wq = _pad2(nrm(lk[0], (H_REAL, H_REAL)), H_PAD, H_PAD)
        wk = _pad2(nrm(lk[1], (H_REAL, H_REAL)), H_PAD, H_PAD)
        wv = _pad2(nrm(lk[2], (H_REAL, H_REAL)), H_PAD, H_PAD)
        wqkv.append(jnp.concatenate([wq, wk, wv], axis=1))                 # (H_PAD, 3*H_PAD)
        zero_h = _pad_row(jnp.zeros((H_REAL,), jnp.float32), H_PAD)
        bqkv.append(jnp.concatenate([zero_h, zero_h, zero_h], axis=1))     # (1, 3*H_PAD)
        wo.append(_pad2(nrm(lk[3], (H_REAL, H_REAL)), H_PAD, H_PAD))
        bo.append(zero_h)
        ln1g.append(_pad_row(jnp.ones((H_REAL,), jnp.float32), H_PAD))
        ln1b.append(zero_h)
        w1.append(_pad2(nrm(lk[4], (H_REAL, I_REAL)), H_PAD, I_PAD))
        b1.append(_pad_row(jnp.zeros((I_REAL,), jnp.float32), I_PAD))
        w2.append(_pad2(nrm(lk[5], (I_REAL, H_REAL)), I_PAD, H_PAD))
        b2.append(zero_h)
        ln2g.append(_pad_row(jnp.ones((H_REAL,), jnp.float32), H_PAD))
        ln2b.append(zero_h)

    params.update({
        'wqkv': jnp.stack(wqkv).astype(jnp.bfloat16),    # (L, H_PAD, 3*H_PAD)
        'bqkv': jnp.stack(bqkv),                         # (L, 1, 3*H_PAD)
        'wo': jnp.stack(wo).astype(jnp.bfloat16),
        'bo': jnp.stack(bo),
        'ln1_g': jnp.stack(ln1g), 'ln1_b': jnp.stack(ln1b),
        'w1': jnp.stack(w1).astype(jnp.bfloat16), 'b1': jnp.stack(b1),
        'w2': jnp.stack(w2).astype(jnp.bfloat16), 'b2': jnp.stack(b2),
        'ln2_g': jnp.stack(ln2g), 'ln2_b': jnp.stack(ln2b),
    })
    return params


# ----------------------------- main --------------------------------------------
if __name__ == "__main__":
    key = jax.random.PRNGKey(0)
    pkey, dkey = jax.random.split(key)
    params = init_params(pkey)

    k1, k2 = jax.random.split(dkey)
    input_ids = jax.random.randint(k1, (BATCH, SEQ), 0, VOCAB, dtype=jnp.int32)
    input_ids_right = jax.random.randint(k2, (BATCH, SEQ), 0, VOCAB, dtype=jnp.int32)
    attention_mask = jnp.array([[1, 1, 1, 1, 1, 1, 0, 0],
                                [1, 1, 1, 1, 1, 1, 1, 1]], dtype=jnp.int32)
    attention_mask_right = jnp.array([[1, 1, 1, 1, 1, 1, 1, 1],
                                      [1, 1, 1, 1, 0, 0, 0, 0]], dtype=jnp.int32)
    labels = jnp.array([0, 1], dtype=jnp.int32)

    forward = jax.jit(contrastive_pretrain_forward)
    (loss,) = forward(params, input_ids, attention_mask, labels,
                      input_ids_right, attention_mask_right)
    loss = jax.block_until_ready(loss)
    assert bool(jnp.isfinite(loss)), "loss is not finite"
    print("KERNEL_OK")
</pallas_src>

<mosaic_0001>
module attributes {stable_mosaic.version = 11 : i64} {
  func.func @pool_proj_supcon_kernel(%arg0: memref<4x8x128xf32, #tpu.memory_space<vmem>>, %arg1: memref<4x8x1xf32, #tpu.memory_space<vmem>>, %arg2: memref<1x4xi32, #tpu.memory_space<vmem>>, %arg3: memref<4x1xi32, #tpu.memory_space<vmem>>, %arg4: memref<128x128xbf16, #tpu.memory_space<vmem>>, %arg5: memref<1x128xf32, #tpu.memory_space<vmem>>, %arg6: memref<1x1xf32, #tpu.memory_space<vmem>>) attributes {dimension_semantics = [], scalar_prefetch = 0 : i64, scratch_operands = 0 : i64, tpu.core_type = #tpu.core_type<tc>} {
    %c0 = arith.constant 0 : index
    %c0_0 = arith.constant 0 : index
    %c0_1 = arith.constant 0 : index
    %0 = vector.load %arg0[%c0, %c0_0, %c0_1] : memref<4x8x128xf32, #tpu.memory_space<vmem>>, vector<4x8x128xf32>
    %c0_2 = arith.constant 0 : index
    %c0_3 = arith.constant 0 : index
    %c0_4 = arith.constant 0 : index
    %1 = vector.load %arg1[%c0_2, %c0_3, %c0_4] : memref<4x8x1xf32, #tpu.memory_space<vmem>>, vector<4x8x1xf32>
    %2 = vector.broadcast %1 : vector<4x8x1xf32> to vector<4x8x128xf32>
    %3 = arith.mulf %0, %2 : vector<4x8x128xf32>
    %cst = arith.constant dense<0.000000e+00> : vector<4x128xf32>
    %4 = vector.multi_reduction <add>, %3, %cst [1] : vector<4x8x128xf32> to vector<4x128xf32>
    %cst_5 = arith.constant dense<0.000000e+00> : vector<4x1xf32>
    %5 = vector.multi_reduction <add>, %1, %cst_5 [1] : vector<4x8x1xf32> to vector<4x1xf32>
    %cst_6 = arith.constant 9.99999971E-10 : f32
    %6 = vector.broadcast %cst_6 : f32 to vector<4x1xf32>
    %7 = arith.maximumf %5, %6 : vector<4x1xf32>
    %8 = tpu.reciprocal %7 {approx = true} : vector<4x1xf32> -> vector<4x1xf32>
    %9 = vector.broadcast %8 : vector<4x1xf32> to vector<4x128xf32>
    %10 = arith.mulf %4, %9 : vector<4x128xf32>
    %11 = arith.truncf %10 : vector<4x128xf32> to vector<4x128xbf16>
    %c0_7 = arith.constant 0 : index
    %c0_8 = arith.constant 0 : index
    %12 = vector.load %arg4[%c0_7, %c0_8] : memref<128x128xbf16, #tpu.memory_space<vmem>>, vector<128x128xbf16>
    %cst_9 = arith.constant dense<0.000000e+00> : vector<4x128xf32>
    %13 = tpu.matmul %11, %12, %cst_9 {dimension_numbers = #tpu.dot_dimension_numbers<[1], [0], [0], [1], [0, 0, 1, 1], [], []>} : vector<4x128xbf16>, vector<128x128xbf16>, vector<4x128xf32> -> vector<4x128xf32>
    %c0_10 = arith.constant 0 : index
    %c0_11 = arith.constant 0 : index
    %14 = vector.load %arg5[%c0_10, %c0_11] : memref<1x128xf32, #tpu.memory_space<vmem>>, vector<1x128xf32>
    %15 = vector.broadcast %14 : vector<1x128xf32> to vector<4x128xf32>
    %16 = arith.addf %13, %15 : vector<4x128xf32>
    %17 = math.tanh %16 : vector<4x128xf32>
    %18 = arith.mulf %17, %17 : vector<4x128xf32>
    %cst_12 = arith.constant dense<0.000000e+00> : vector<4xf32>
    %19 = vector.multi_reduction <add>, %18, %cst_12 [1] : vector<4x128xf32> to vector<4xf32>
    %20 = vector.shape_cast %19 : vector<4xf32> to vector<4x1xf32>
    %cst_13 = arith.constant 1.000000e-24 : f32
    %21 = vector.broadcast %cst_13 : f32 to vector<4x1xf32>
    %22 = arith.maximumf %20, %21 : vector<4x1xf32>
    %23 = math.rsqrt %22 : vector<4x1xf32>
    %24 = vector.broadcast %23 : vector<4x1xf32> to vector<4x128xf32>
    %25 = arith.mulf %17, %24 : vector<4x128xf32>
    %26 = arith.truncf %25 : vector<4x128xf32> to vector<4x128xbf16>
    "tpu.trace_start"() <{level = 10 : i32, message = "id,jd->ij"}> : () -> ()
    %cst_14 = arith.constant dense<0.000000e+00> : vector<4x4xf32>
    %27 = tpu.matmul %26, %26, %cst_14 {dimension_numbers = #tpu.dot_dimension_numbers<[1], [1], [0], [0], [0, 0, 1, 0], [], []>} : vector<4x128xbf16>, vector<4x128xbf16>, vector<4x4xf32> -> vector<4x4xf32>
    "tpu.trace_stop"() : () -> ()
    %cst_15 = arith.constant 14.2857141 : f32
    %28 = vector.broadcast %cst_15 : f32 to vector<4x4xf32>
    %29 = arith.mulf %27, %28 : vector<4x4xf32>
    %cst_16 = arith.constant dense<0xFF800000> : vector<4xf32>
    %30 = vector.multi_reduction <maximumf>, %29, %cst_16 [1] : vector<4x4xf32> to vector<4xf32>
    %31 = vector.shape_cast %30 : vector<4xf32> to vector<4x1xf32>
    %32 = vector.broadcast %31 : vector<4x1xf32> to vector<4x4xf32>
    %33 = arith.subf %29, %32 : vector<4x4xf32>
    %34 = tpu.iota {dimensions = array<i32: 0>} : vector<4x4xi32>
    %35 = tpu.iota {dimensions = array<i32: 1>} : vector<4x4xi32>
    %36 = arith.cmpi ne, %34, %35 : vector<4x4xi32>
    %37 = arith.extui %36 : vector<4x4xi1> to vector<4x4xi32>
    %38 = arith.sitofp %37 : vector<4x4xi32> to vector<4x4xf32>
    %c0_17 = arith.constant 0 : index
    %c0_18 = arith.constant 0 : index
    %39 = vector.load %arg3[%c0_17, %c0_18] : memref<4x1xi32, #tpu.memory_space<vmem>>, vector<4x1xi32>
    %c0_19 = arith.constant 0 : index
    %c0_20 = arith.constant 0 : index
    %40 = vector.load %arg2[%c0_19, %c0_20] : memref<1x4xi32, #tpu.memory_space<vmem>>, vector<1x4xi32>
    %41 = vector.broadcast %39 : vector<4x1xi32> to vector<4x4xi32>
    %42 = vector.broadcast %40 : vector<1x4xi32> to vector<4x4xi32>
    %43 = arith.cmpi eq, %41, %42 : vector<4x4xi32>
    %44 = arith.extui %43 : vector<4x4xi1> to vector<4x4xi32>
    %45 = arith.sitofp %44 : vector<4x4xi32> to vector<4x4xf32>
    %46 = arith.mulf %45, %38 : vector<4x4xf32>
    %47 = math.exp %33 : vector<4x4xf32>
    %48 = arith.mulf %47, %38 : vector<4x4xf32>
    %cst_21 = arith.constant dense<0.000000e+00> : vector<4xf32>
    %49 = vector.multi_reduction <add>, %48, %cst_21 [1] : vector<4x4xf32> to vector<4xf32>
    %50 = vector.shape_cast %49 : vector<4xf32> to vector<4x1xf32>
    %51 = math.log %50 : vector<4x1xf32>
    %52 = vector.broadcast %51 : vector<4x1xf32> to vector<4x4xf32>
    %53 = arith.subf %33, %52 : vector<4x4xf32>
    %cst_22 = arith.constant dense<0.000000e+00> : vector<4xf32>
    %54 = vector.multi_reduction <add>, %46, %cst_22 [1] : vector<4x4xf32> to vector<4xf32>
    %55 = vector.shape_cast %54 : vector<4xf32> to vector<4x1xf32>
    %cst_23 = arith.constant 1.000000e+00 : f32
    %56 = vector.broadcast %cst_23 : f32 to vector<4x1xf32>
    %57 = arith.maximumf %55, %56 : vector<4x1xf32>
    %58 = arith.mulf %46, %53 : vector<4x4xf32>
    %cst_24 = arith.constant dense<0.000000e+00> : vector<4xf32>
    %59 = vector.multi_reduction <add>, %58, %cst_24 [1] : vector<4x4xf32> to vector<4xf32>
    %60 = vector.shape_cast %59 : vector<4xf32> to vector<4x1xf32>
    %61 = arith.divf %60, %57 : vector<4x1xf32>
    %cst_25 = arith.constant -1.000000e+00 : f32
    %62 = vector.broadcast %cst_25 : f32 to vector<4x1xf32>
    %63 = arith.mulf %62, %61 : vector<4x1xf32>
    %64 = vector.shape_cast %63 : vector<4x1xf32> to vector<1x4x1xf32>
    %cst_26 = arith.constant dense<0.000000e+00> : vector<1xf32>
    %65 = vector.multi_reduction <add>, %64, %cst_26 [1, 2] : vector<1x4x1xf32> to vector<1xf32>
    %66 = vector.shape_cast %65 : vector<1xf32> to vector<1x1x1xf32>
    %67 = vector.extract %66[0, 0, 0] : f32 from vector<1x1x1xf32>
    %68 = vector.broadcast %67 : f32 to vector<1x1xf32>
    %cst_27 = arith.constant 4.000000e+00 : f32
    %69 = vector.broadcast %cst_27 : f32 to vector<1x1xf32>
    %70 = arith.divf %68, %69 : vector<1x1xf32>
    %c0_28 = arith.constant 0 : index
    %c0_29 = arith.constant 0 : index
    %71 = vector.load %arg6[%c0_28, %c0_29] : memref<1x1xf32, #tpu.memory_space<vmem>>, vector<1x1xf32>
    tpu.vector_store %arg6[%c0_28, %c0_29], %70 {strides = array<i32>} : memref<1x1xf32, #tpu.memory_space<vmem>>, vector<1x1xf32>,
    return
  }
}

module attributes {stable_mosaic.version = 11 : i64} {
  func.func @encoder_kernel(%arg0: i32, %arg1: i32, %arg2: memref<2x8x128xf32, #tpu.memory_space<vmem>>, %arg3: memref<2x1x8xf32, #tpu.memory_space<vmem>>, %arg4: memref<1x128xf32, #tpu.memory_space<vmem>>, %arg5: memref<1x128xf32, #tpu.memory_space<vmem>>, %arg6: memref<1x128x384xbf16, #tpu.memory_space<vmem>>, %arg7: memref<1x1x384xf32, #tpu.memory_space<vmem>>, %arg8: memref<1x128x128xbf16, #tpu.memory_space<vmem>>, %arg9: memref<1x1x128xf32, #tpu.memory_space<vmem>>, %arg10: memref<1x1x128xf32, #tpu.memory_space<vmem>>, %arg11: memref<1x1x128xf32, #tpu.memory_space<vmem>>, %arg12: memref<1x128x128xbf16, #tpu.memory_space<vmem>>, %arg13: memref<1x1x128xf32, #tpu.memory_space<vmem>>, %arg14: memref<1x128x128xbf16, #tpu.memory_space<vmem>>, %arg15: memref<1x1x128xf32, #tpu.memory_space<vmem>>, %arg16: memref<1x1x128xf32, #tpu.memory_space<vmem>>, %arg17: memref<1x1x128xf32, #tpu.memory_space<vmem>>, %arg18: memref<2x8x128xf32, #tpu.memory_space<vmem>>) attributes {dimension_semantics = [#tpu.dimension_semantics<parallel>, #tpu.dimension_semantics<arbitrary>], iteration_bounds = array<i64: 2, 2>, scalar_prefetch = 0 : i64, scratch_operands = 0 : i64, tpu.core_type = #tpu.core_type<tc>, window_params = [{transform_indices = @transform_0, window_bounds = array<i64: 2, 8, 128>}, {transform_indices = @transform_1, window_bounds = array<i64: 2, 1, 8>}, {pipeline_mode = #tpu.pipeline_mode<synchronous>, transform_indices = @transform_2, window_bounds = array<i64: 1, 128>}, {pipeline_mode = #tpu.pipeline_mode<synchronous>, transform_indices = @transform_3, window_bounds = array<i64: 1, 128>}, {transform_indices = @transform_4, window_bounds = array<i64: 1, 128, 384>}, {transform_indices = @transform_5, window_bounds = array<i64: 1, 1, 384>}, {transform_indices = @transform_6, window_bounds = array<i64: 1, 128, 128>}, {transform_indices = @transform_7, window_bounds = array<i64: 1, 1, 128>}, {transform_indices = @transform_8, window_bounds = array<i64: 1, 1, 128>}, {transform_indices = @transform_9, window_bounds = array<i64: 1, 1, 128>}, {transform_indices = @transform_10, window_bounds = array<i64: 1, 128, 128>}, {transform_indices = @transform_11, window_bounds = array<i64: 1, 1, 128>}, {transform_indices = @transform_12, window_bounds = array<i64: 1, 128, 128>}, {transform_indices = @transform_13, window_bounds = array<i64: 1, 1, 128>}, {transform_indices = @transform_14, window_bounds = array<i64: 1, 1, 128>}, {transform_indices = @transform_15, window_bounds = array<i64: 1, 1, 128>}, {transform_indices = @transform_16, window_bounds = array<i64: 2, 8, 128>}]} {
    %c0_i32 = arith.constant 0 : i32
    %0 = arith.cmpi eq, %arg1, %c0_i32 : i32
    %1 = arith.extui %0 : i1 to i32
    %c0_i32_0 = arith.constant 0 : i32
    %2 = arith.cmpi ne, %1, %c0_i32_0 : i32
    scf.if %2 {
      %c0_76 = arith.constant 0 : index
      %c0_77 = arith.constant 0 : index
      %c0_78 = arith.constant 0 : index
      %178 = vector.load %arg2[%c0_76, %c0_77, %c0_78] : memref<2x8x128xf32, #tpu.memory_space<vmem>>, vector<2x8x128xf32>
      %179 = vector.shape_cast %178 : vector<2x8x128xf32> to vector<16x128xf32>
      %c0_79 = arith.constant 0 : index
      %c0_80 = arith.constant 0 : index
      %180 = vector.load %arg4[%c0_79, %c0_80] : memref<1x128xf32, #tpu.memory_space<vmem>>, vector<1x128xf32>
      %c0_81 = arith.constant 0 : index
      %c0_82 = arith.constant 0 : index
      %181 = vector.load %arg5[%c0_81, %c0_82] : memref<1x128xf32, #tpu.memory_space<vmem>>, vector<1x128xf32>
      %182 = tpu.iota {dimensions = array<i32: 1>} : vector<16x128xi32>
      %c32_i32_83 = arith.constant 32 : i32
      %183 = vector.broadcast %c32_i32_83 : i32 to vector<16x128xi32>
      %184 = arith.cmpi slt, %182, %183 : vector<16x128xi32>
      %185 = arith.extui %184 : vector<16x128xi1> to vector<16x128xi32>
      %186 = arith.sitofp %185 : vector<16x128xi32> to vector<16x128xf32>
      %cst_84 = arith.constant dense<0.000000e+00> : vector<16xf32>
      %187 = vector.multi_reduction <add>, %179, %cst_84 [1] : vector<16x128xf32> to vector<16xf32>
      %188 = vector.shape_cast %187 : vector<16xf32> to vector<16x1xf32>
      %cst_85 = arith.constant 3.125000e-02 : f32
      %189 = vector.broadcast %cst_85 : f32 to vector<16x1xf32>
      %190 = arith.mulf %188, %189 : vector<16x1xf32>
      %191 = vector.broadcast %190 : vector<16x1xf32> to vector<16x128xf32>
      %192 = arith.subf %179, %191 : vector<16x128xf32>
      %193 = arith.mulf %192, %186 : vector<16x128xf32>
      %194 = arith.mulf %193, %193 : vector<16x128xf32>
      %cst_86 = arith.constant dense<0.000000e+00> : vector<16xf32>
      %195 = vector.multi_reduction <add>, %194, %cst_86 [1] : vector<16x128xf32> to vector<16xf32>
      %196 = vector.shape_cast %195 : vector<16xf32> to vector<16x1xf32>
      %cst_87 = arith.constant 3.125000e-02 : f32
      %197 = vector.broadcast %cst_87 : f32 to vector<16x1xf32>
      %198 = arith.mulf %196, %197 : vector<16x1xf32>
      %199 = vector.broadcast %190 : vector<16x1xf32> to vector<16x128xf32>
      %200 = arith.subf %179, %199 : vector<16x128xf32>
      %cst_88 = arith.constant 9.99999996E-13 : f32
      %201 = vector.broadcast %cst_88 : f32 to vector<16x1xf32>
      %202 = arith.addf %198, %201 : vector<16x1xf32>
      %203 = math.rsqrt %202 : vector<16x1xf32>
      %204 = vector.broadcast %203 : vector<16x1xf32> to vector<16x128xf32>
      %205 = arith.mulf %200, %204 : vector<16x128xf32>
      %206 = vector.broadcast %180 : vector<1x128xf32> to vector<16x128xf32>
      %207 = arith.mulf %205, %206 : vector<16x128xf32>
      %208 = vector.broadcast %181 : vector<1x128xf32> to vector<16x128xf32>
      %209 = arith.addf %207, %208 : vector<16x128xf32>
      %210 = vector.shape_cast %209 : vector<16x128xf32> to vector<2x8x128xf32>
      %c0_89 = arith.constant 0 : index
      %c0_90 = arith.constant 0 : index
      %c0_91 = arith.constant 0 : index
      %211 = vector.load %arg18[%c0_89, %c0_90, %c0_91] : memref<2x8x128xf32, #tpu.memory_space<vmem>>, vector<2x8x128xf32>
      tpu.vector_store %arg18[%c0_89, %c0_90, %c0_91], %210 {strides = array<i32>} : memref<2x8x128xf32, #tpu.memory_space<vmem>>, vector<2x8x128xf32>,
    } else {
    }
    %c0 = arith.constant 0 : index
    %c0_1 = arith.constant 0 : index
    %c0_2 = arith.constant 0 : index
    %3 = vector.load %arg18[%c0, %c0_1, %c0_2] : memref<2x8x128xf32, #tpu.memory_space<vmem>>, vector<2x8x128xf32>
    %4 = vector.shape_cast %3 : vector<2x8x128xf32> to vector<16x128xf32>
    %5 = arith.truncf %4 : vector<16x128xf32> to vector<16x128xbf16>
    %c0_3 = arith.constant 0 : index
    %c0_4 = arith.constant 0 : index
    %c0_5 = arith.constant 0 : index
    %6 = vector.load %arg6[%c0_3, %c0_4, %c0_5] : memref<1x128x384xbf16, #tpu.memory_space<vmem>>, vector<1x128x384xbf16>
    %7 = vector.shape_cast %6 : vector<1x128x384xbf16> to vector<128x384xbf16>
    %cst = arith.constant dense<0.000000e+00> : vector<16x384xf32>
    %8 = tpu.matmul %5, %7, %cst {dimension_numbers = #tpu.dot_dimension_numbers<[1], [0], [0], [1], [0, 0, 1, 1], [], []>} : vector<16x128xbf16>, vector<128x384xbf16>, vector<16x384xf32> -> vector<16x384xf32>
    %c0_6 = arith.constant 0 : index
    %c0_7 = arith.constant 0 : index
    %c0_8 = arith.constant 0 : index
    %9 = vector.load %arg7[%c0_6, %c0_7, %c0_8] : memref<1x1x384xf32, #tpu.memory_space<vmem>>, vector<1x1x384xf32>
    %10 = vector.shape_cast %9 : vector<1x1x384xf32> to vector<1x384xf32>
    %11 = vector.broadcast %10 : vector<1x384xf32> to vector<16x384xf32>
    %12 = arith.addf %8, %11 : vector<16x384xf32>
    %13 = vector.extract_strided_slice %12 {offsets = [0, 0], sizes = [16, 128], strides = [1, 1]} : vector<16x384xf32> to vector<16x128xf32>
    %14 = vector.shape_cast %13 : vector<16x128xf32> to vector<2x8x128xf32>
    %15 = vector.extract_strided_slice %12 {offsets = [0, 128], sizes = [16, 128], strides = [1, 1]} : vector<16x384xf32> to vector<16x128xf32>
    %16 = vector.shape_cast %15 : vector<16x128xf32> to vector<2x8x128xf32>
    %17 = vector.extract_strided_slice %12 {offsets = [0, 256], sizes = [16, 128], strides = [1, 1]} : vector<16x384xf32> to vector<16x128xf32>
    %18 = vector.shape_cast %17 : vector<16x128xf32> to vector<2x8x128xf32>
    %c0_9 = arith.constant 0 : index
    %c0_10 = arith.constant 0 : index
    %c0_11 = arith.constant 0 : index
    %19 = vector.load %arg3[%c0_9, %c0_10, %c0_11] : memref<2x1x8xf32, #tpu.memory_space<vmem>>, vector<2x1x8xf32>
    %c0_12 = arith.constant 0 : index
    %c0_13 = arith.constant 0 : index
    %c0_14 = arith.constant 0 : index
    %20 = vector.load %arg9[%c0_12, %c0_13, %c0_14] : memref<1x1x128xf32, #tpu.memory_space<vmem>>, vector<1x1x128xf32>
    %21 = vector.shape_cast %20 : vector<1x1x128xf32> to vector<1x128xf32>
    %22 = vector.extract_strided_slice %14 {offsets = [0, 0, 0], sizes = [2, 8, 16], strides = [1, 1, 1]} : vector<2x8x128xf32> to vector<2x8x16xf32>
    %23 = arith.truncf %22 : vector<2x8x16xf32> to vector<2x8x16xbf16>
    %24 = vector.extract_strided_slice %16 {offsets = [0, 0, 0], sizes = [2, 8, 16], strides = [1, 1, 1]} : vector<2x8x128xf32> to vector<2x8x16xf32>
    %25 = arith.truncf %24 : vector<2x8x16xf32> to vector<2x8x16xbf16>
    %26 = vector.extract_strided_slice %18 {offsets = [0, 0, 0], sizes = [2, 8, 16], strides = [1, 1, 1]} : vector<2x8x128xf32> to vector<2x8x16xf32>
    %27 = arith.truncf %26 : vector<2x8x16xf32> to vector<2x8x16xbf16>
    "tpu.trace_start"() <{level = 10 : i32, message = "bqd,bkd->bqk"}> : () -> ()
    %cst_15 = arith.constant dense<0.000000e+00> : vector<2x8x8xf32>
    %28 = tpu.matmul %23, %25, %cst_15 {dimension_numbers = #tpu.dot_dimension_numbers<[2], [2], [1], [1], [0, 0, 0, 1, 1, 1], [0], [0]>} : vector<2x8x16xbf16>, vector<2x8x16xbf16>, vector<2x8x8xf32> -> vector<2x8x8xf32>
    "tpu.trace_stop"() : () -> ()
    %cst_16 = arith.constant 2.500000e-01 : f32
    %29 = vector.broadcast %cst_16 : f32 to vector<2x8x8xf32>
    %30 = arith.mulf %28, %29 : vector<2x8x8xf32>
    %31 = vector.broadcast %19 : vector<2x1x8xf32> to vector<2x8x8xf32>
    %32 = arith.addf %30, %31 : vector<2x8x8xf32>
    %cst_17 = arith.constant dense<0xFF800000> : vector<2x8xf32>
    %33 = vector.multi_reduction <maximumf>, %32, %cst_17 [2] : vector<2x8x8xf32> to vector<2x8xf32>
    %34 = vector.shape_cast %33 : vector<2x8xf32> to vector<2x8x1xf32>
    %35 = vector.broadcast %34 : vector<2x8x1xf32> to vector<2x8x8xf32>
    %36 = arith.subf %32, %35 : vector<2x8x8xf32>
    %37 = math.exp %36 : vector<2x8x8xf32>
    %cst_18 = arith.constant dense<0.000000e+00> : vector<2x8xf32>
    %38 = vector.multi_reduction <add>, %37, %cst_18 [2] : vector<2x8x8xf32> to vector<2x8xf32>
    %39 = vector.shape_cast %38 : vector<2x8xf32> to vector<2x8x1xf32>
    %40 = tpu.reciprocal %39 {approx = true} : vector<2x8x1xf32> -> vector<2x8x1xf32>
    %41 = vector.broadcast %40 : vector<2x8x1xf32> to vector<2x8x8xf32>
    %42 = arith.mulf %37, %41 : vector<2x8x8xf32>
    %43 = arith.truncf %42 : vector<2x8x8xf32> to vector<2x8x8xbf16>
    "tpu.trace_start"() <{level = 10 : i32, message = "bqk,bkd->bqd"}> : () -> ()
    %cst_19 = arith.constant dense<0.000000e+00> : vector<2x8x16xf32>
    %44 = tpu.matmul %43, %27, %cst_19 {dimension_numbers = #tpu.dot_dimension_numbers<[2], [1], [1], [2], [0, 0, 0, 1, 1, 2], [0], [0]>} : vector<2x8x8xbf16>, vector<2x8x16xbf16>, vector<2x8x16xf32> -> vector<2x8x16xf32>
    "tpu.trace_stop"() : () -> ()
    %45 = vector.shape_cast %44 : vector<2x8x16xf32> to vector<16x16xf32>
    %46 = arith.truncf %45 : vector<16x16xf32> to vector<16x16xbf16>
    %c0_20 = arith.constant 0 : index
    %c0_21 = arith.constant 0 : index
    %c0_22 = arith.constant 0 : index
    %47 = vector.load %arg8[%c0_20, %c0_21, %c0_22] : memref<1x128x128xbf16, #tpu.memory_space<vmem>>, vector<1x16x128xbf16>
    %48 = vector.shape_cast %47 : vector<1x16x128xbf16> to vector<16x128xbf16>
    %cst_23 = arith.constant dense<0.000000e+00> : vector<16x128xf32>
    %49 = tpu.matmul %46, %48, %cst_23 {dimension_numbers = #tpu.dot_dimension_numbers<[1], [0], [0], [1], [0, 0, 1, 1], [], []>} : vector<16x16xbf16>, vector<16x128xbf16>, vector<16x128xf32> -> vector<16x128xf32>
    %50 = vector.broadcast %21 : vector<1x128xf32> to vector<16x128xf32>
    %51 = arith.addf %50, %49 : vector<16x128xf32>
    %52 = vector.extract_strided_slice %14 {offsets = [0, 0, 16], sizes = [2, 8, 16], strides = [1, 1, 1]} : vector<2x8x128xf32> to vector<2x8x16xf32>
    %53 = arith.truncf %52 : vector<2x8x16xf32> to vector<2x8x16xbf16>
    %54 = vector.extract_strided_slice %16 {offsets = [0, 0, 16], sizes = [2, 8, 16], strides = [1, 1, 1]} : vector<2x8x128xf32> to vector<2x8x16xf32>
    %55 = arith.truncf %54 : vector<2x8x16xf32> to vector<2x8x16xbf16>
    %56 = vector.extract_strided_slice %18 {offsets = [0, 0, 16], sizes = [2, 8, 16], strides = [1, 1, 1]} : vector<2x8x128xf32> to vector<2x8x16xf32>
    %57 = arith.truncf %56 : vector<2x8x16xf32> to vector<2x8x16xbf16>
    "tpu.trace_start"() <{level = 10 : i32, message = "bqd,bkd->bqk"}> : () -> ()
    %cst_24 = arith.constant dense<0.000000e+00> : vector<2x8x8xf32>
    %58 = tpu.matmul %53, %55, %cst_24 {dimension_numbers = #tpu.dot_dimension_numbers<[2], [2], [1], [1], [0, 0, 0, 1, 1, 1], [0], [0]>} : vector<2x8x16xbf16>, vector<2x8x16xbf16>, vector<2x8x8xf32> -> vector<2x8x8xf32>
    "tpu.trace_stop"() : () -> ()
    %cst_25 = arith.constant 2.500000e-01 : f32
    %59 = vector.broadcast %cst_25 : f32 to vector<2x8x8xf32>
    %60 = arith.mulf %58, %59 : vector<2x8x8xf32>
    %61 = vector.broadcast %19 : vector<2x1x8xf32> to vector<2x8x8xf32>
    %62 = arith.addf %60, %61 : vector<2x8x8xf32>
    %cst_26 = arith.constant dense<0xFF800000> : vector<2x8xf32>
    %63 = vector.multi_reduction <maximumf>, %62, %cst_26 [2] : vector<2x8x8xf32> to vector<2x8xf32>
    %64 = vector.shape_cast %63 : vector<2x8xf32> to vector<2x8x1xf32>
    %65 = vector.broadcast %64 : vector<2x8x1xf32> to vector<2x8x8xf32>
    %66 = arith.subf %62, %65 : vector<2x8x8xf32>
    %67 = math.exp %66 : vector<2x8x8xf32>
    %cst_27 = arith.constant dense<0.000000e+00> : vector<2x8xf32>
    %68 = vector.multi_reduction <add>, %67, %cst_27 [2] : vector<2x8x8xf32> to vector<2x8xf32>
    %69 = vector.shape_cast %68 : vector<2x8xf32> to vector<2x8x1xf32>
    %70 = tpu.reciprocal %69 {approx = true} : vector<2x8x1xf32> -> vector<2x8x1xf32>
    %71 = vector.broadcast %70 : vector<2x8x1xf32> to vector<2x8x8xf32>
    %72 = arith.mulf %67, %71 : vector<2x8x8xf32>
    %73 = arith.truncf %72 : vector<2x8x8xf32> to vector<2x8x8xbf16>
    "tpu.trace_start"() <{level = 10 : i32, message = "bqk,bkd->bqd"}> : () -> ()
    %cst_28 = arith.constant dense<0.000000e+00> : vector<2x8x16xf32>
    %74 = tpu.matmul %73, %57, %cst_28 {dimension_numbers = #tpu.dot_dimension_numbers<[2], [1], [1], [2], [0, 0, 0, 1, 1, 2], [0], [0]>} : vector<2x8x8xbf16>, vector<2x8x16xbf16>, vector<2x8x16xf32> -> vector<2x8x16xf32>
    "tpu.trace_stop"() : () -> ()
    %75 = vector.shape_cast %74 : vector<2x8x16xf32> to vector<16x16xf32>
    %76 = arith.truncf %75 : vector<16x16xf32> to vector<16x16xbf16>
    %c0_29 = arith.constant 0 : index
    %c16 = arith.constant 16 : index
    %c0_30 = arith.constant 0 : index
    %77 = vector.load %arg8[%c0_29, %c16, %c0_30] : memref<1x128x128xbf16, #tpu.memory_space<vmem>>, vector<1x16x128xbf16>
    %78 = vector.shape_cast %77 : vector<1x16x128xbf16> to vector<16x128xbf16>
    %cst_31 = arith.constant dense<0.000000e+00> : vector<16x128xf32>
    %79 = tpu.matmul %76, %78, %cst_31 {dimension_numbers = #tpu.dot_dimension_numbers<[1], [0], [0], [1], [0, 0, 1, 1], [], []>} : vector<16x16xbf16>, vector<16x128xbf16>, vector<16x128xf32> -> vector<16x128xf32>
    %80 = arith.addf %51, %79 : vector<16x128xf32>
    %81 = arith.addf %4, %80 : vector<16x128xf32>
    %c0_32 = arith.constant 0 : index
    %c0_33 = arith.constant 0 : index
    %c0_34 = arith.constant 0 : index
    %82 = vector.load %arg10[%c0_32, %c0_33, %c0_34] : memref<1x1x128xf32, #tpu.memory_space<vmem>>, vector<1x1x128xf32>
    %83 = vector.shape_cast %82 : vector<1x1x128xf32> to vector<1x128xf32>
    %c0_35 = arith.constant 0 : index
    %c0_36 = arith.constant 0 : index
    %c0_37 = arith.constant 0 : index
    %84 = vector.load %arg11[%c0_35, %c0_36, %c0_37] : memref<1x1x128xf32, #tpu.memory_space<vmem>>, vector<1x1x128xf32>
    %85 = vector.shape_cast %84 : vector<1x1x128xf32> to vector<1x128xf32>
    %86 = tpu.iota {dimensions = array<i32: 1>} : vector<16x128xi32>
    %c32_i32 = arith.constant 32 : i32
    %87 = vector.broadcast %c32_i32 : i32 to vector<16x128xi32>
    %88 = arith.cmpi slt, %86, %87 : vector<16x128xi32>
    %89 = arith.extui %88 : vector<16x128xi1> to vector<16x128xi32>
    %90 = arith.sitofp %89 : vector<16x128xi32> to vector<16x128xf32>
    %cst_38 = arith.constant dense<0.000000e+00> : vector<16xf32>
    %91 = vector.multi_reduction <add>, %81, %cst_38 [1] : vector<16x128xf32> to vector<16xf32>
    %92 = vector.shape_cast %91 : vector<16xf32> to vector<16x1xf32>
    %cst_39 = arith.constant 3.125000e-02 : f32
    %93 = vector.broadcast %cst_39 : f32 to vector<16x1xf32>
    %94 = arith.mulf %92, %93 : vector<16x1xf32>
    %95 = vector.broadcast %94 : vector<16x1xf32> to vector<16x128xf32>
    %96 = arith.subf %81, %95 : vector<16x128xf32>
    %97 = arith.mulf %96, %90 : vector<16x128xf32>
    %98 = arith.mulf %97, %97 : vector<16x128xf32>
    %cst_40 = arith.constant dense<0.000000e+00> : vector<16xf32>
    %99 = vector.multi_reduction <add>, %98, %cst_40 [1] : vector<16x128xf32> to vector<16xf32>
    %100 = vector.shape_cast %99 : vector<16xf32> to vector<16x1xf32>
    %cst_41 = arith.constant 3.125000e-02 : f32
    %101 = vector.broadcast %cst_41 : f32 to vector<16x1xf32>
    %102 = arith.mulf %100, %101 : vector<16x1xf32>
    %103 = vector.broadcast %94 : vector<16x1xf32> to vector<16x128xf32>
    %104 = arith.subf %81, %103 : vector<16x128xf32>
    %cst_42 = arith.constant 9.99999996E-13 : f32
    %105 = vector.broadcast %cst_42 : f32 to vector<16x1xf32>
    %106 = arith.addf %102, %105 : vector<16x1xf32>
    %107 = math.rsqrt %106 : vector<16x1xf32>
    %108 = vector.broadcast %107 : vector<16x1xf32> to vector<16x128xf32>
    %109 = arith.mulf %104, %108 : vector<16x128xf32>
    %110 = vector.broadcast %83 : vector<1x128xf32> to vector<16x128xf32>
    %111 = arith.mulf %109, %110 : vector<16x128xf32>
    %112 = vector.broadcast %85 : vector<1x128xf32> to vector<16x128xf32>
    %113 = arith.addf %111, %112 : vector<16x128xf32>
    %114 = arith.truncf %113 : vector<16x128xf32> to vector<16x128xbf16>
    %c0_43 = arith.constant 0 : index
    %c0_44 = arith.constant 0 : index
    %c0_45 = arith.constant 0 : index
    %115 = vector.load %arg12[%c0_43, %c0_44, %c0_45] : memref<1x128x128xbf16, #tpu.memory_space<vmem>>, vector<1x128x128xbf16>
    %116 = vector.shape_cast %115 : vector<1x128x128xbf16> to vector<128x128xbf16>
    %cst_46 = arith.constant dense<0.000000e+00> : vector<16x128xf32>
    %117 = tpu.matmul %114, %116, %cst_46 {dimension_numbers = #tpu.dot_dimension_numbers<[1], [0], [0], [1], [0, 0, 1, 1], [], []>} : vector<16x128xbf16>, vector<128x128xbf16>, vector<16x128xf32> -> vector<16x128xf32>
    %c0_47 = arith.constant 0 : index
    %c0_48 = arith.constant 0 : index
    %c0_49 = arith.constant 0 : index
    %118 = vector.load %arg13[%c0_47, %c0_48, %c0_49] : memref<1x1x128xf32, #tpu.memory_space<vmem>>, vector<1x1x128xf32>
    %119 = vector.shape_cast %118 : vector<1x1x128xf32> to vector<1x128xf32>
    %120 = vector.broadcast %119 : vector<1x128xf32> to vector<16x128xf32>
    %121 = arith.addf %117, %120 : vector<16x128xf32>
    %cst_50 = arith.constant 5.000000e-01 : f32
    %122 = vector.broadcast %cst_50 : f32 to vector<16x128xf32>
    %123 = arith.mulf %122, %121 : vector<16x128xf32>
    %cst_51 = arith.constant 4.471500e-02 : f32
    %124 = vector.broadcast %cst_51 : f32 to vector<16x128xf32>
    %125 = arith.mulf %124, %121 : vector<16x128xf32>
    %126 = arith.mulf %125, %121 : vector<16x128xf32>
    %127 = arith.mulf %126, %121 : vector<16x128xf32>
    %128 = arith.addf %121, %127 : vector<16x128xf32>
    %cst_52 = arith.constant 0.797884583 : f32
    %129 = vector.broadcast %cst_52 : f32 to vector<16x128xf32>
    %130 = arith.mulf %129, %128 : vector<16x128xf32>
    %131 = math.tanh %130 : vector<16x128xf32>
    %cst_53 = arith.constant 1.000000e+00 : f32
    %132 = vector.broadcast %cst_53 : f32 to vector<16x128xf32>
    %133 = arith.addf %132, %131 : vector<16x128xf32>
    %134 = arith.mulf %123, %133 : vector<16x128xf32>
    %135 = arith.truncf %134 : vector<16x128xf32> to vector<16x128xbf16>
    %c0_54 = arith.constant 0 : index
    %c0_55 = arith.constant 0 : index
    %c0_56 = arith.constant 0 : index
    %136 = vector.load %arg14[%c0_54, %c0_55, %c0_56] : memref<1x128x128xbf16, #tpu.memory_space<vmem>>, vector<1x128x128xbf16>
    %137 = vector.shape_cast %136 : vector<1x128x128xbf16> to vector<128x128xbf16>
    %cst_57 = arith.constant dense<0.000000e+00> : vector<16x128xf32>
    %138 = tpu.matmul %135, %137, %cst_57 {dimension_numbers = #tpu.dot_dimension_numbers<[1], [0], [0], [1], [0, 0, 1, 1], [], []>} : vector<16x128xbf16>, vector<128x128xbf16>, vector<16x128xf32> -> vector<16x128xf32>
    %c0_58 = arith.constant 0 : index
    %c0_59 = arith.constant 0 : index
    %c0_60 = arith.constant 0 : index
    %139 = vector.load %arg15[%c0_58, %c0_59, %c0_60] : memref<1x1x128xf32, #tpu.memory_space<vmem>>, vector<1x1x128xf32>
    %140 = vector.shape_cast %139 : vector<1x1x128xf32> to vector<1x128xf32>
    %141 = vector.broadcast %140 : vector<1x128xf32> to vector<16x128xf32>
    %142 = arith.addf %138, %141 : vector<16x128xf32>
    %143 = arith.addf %113, %142 : vector<16x128xf32>
    %c0_61 = arith.constant 0 : index
    %c0_62 = arith.constant 0 : index
    %c0_63 = arith.constant 0 : index
    %144 = vector.load %arg16[%c0_61, %c0_62, %c0_63] : memref<1x1x128xf32, #tpu.memory_space<vmem>>, vector<1x1x128xf32>
    %145 = vector.shape_cast %144 : vector<1x1x128xf32> to vector<1x128xf32>
    %c0_64 = arith.constant 0 : index
    %c0_65 = arith.constant 0 : index
    %c0_66 = arith.constant 0 : index
    %146 = vector.load %arg17[%c0_64, %c0_65, %c0_66] : memref<1x1x128xf32, #tpu.memory_space<vmem>>, vector<1x1x128xf32>
    %147 = vector.shape_cast %146 : vector<1x1x128xf32> to vector<1x128xf32>
    %148 = tpu.iota {dimensions = array<i32: 1>} : vector<16x128xi32>
    %c32_i32_67 = arith.constant 32 : i32
    %149 = vector.broadcast %c32_i32_67 : i32 to vector<16x128xi32>
    %150 = arith.cmpi slt, %148, %149 : vector<16x128xi32>
    %151 = arith.extui %150 : vector<16x128xi1> to vector<16x128xi32>
    %152 = arith.sitofp %151 : vector<16x128xi32> to vector<16x128xf32>
    %cst_68 = arith.constant dense<0.000000e+00> : vector<16xf32>
    %153 = vector.multi_reduction <add>, %143, %cst_68 [1] : vector<16x128xf32> to vector<16xf32>
    %154 = vector.shape_cast %153 : vector<16xf32> to vector<16x1xf32>
    %cst_69 = arith.constant 3.125000e-02 : f32
    %155 = vector.broadcast %cst_69 : f32 to vector<16x1xf32>
    %156 = arith.mulf %154, %155 : vector<16x1xf32>
    %157 = vector.broadcast %156 : vector<16x1xf32> to vector<16x128xf32>
    %158 = arith.subf %143, %157 : vector<16x128xf32>
    %159 = arith.mulf %158, %152 : vector<16x128xf32>
    %160 = arith.mulf %159, %159 : vector<16x128xf32>
    %cst_70 = arith.constant dense<0.000000e+00> : vector<16xf32>
    %161 = vector.multi_reduction <add>, %160, %cst_70 [1] : vector<16x128xf32> to vector<16xf32>
    %162 = vector.shape_cast %161 : vector<16xf32> to vector<16x1xf32>
    %cst_71 = arith.constant 3.125000e-02 : f32
    %163 = vector.broadcast %cst_71 : f32 to vector<16x1xf32>
    %164 = arith.mulf %162, %163 : vector<16x1xf32>
    %165 = vector.broadcast %156 : vector<16x1xf32> to vector<16x128xf32>
    %166 = arith.subf %143, %165 : vector<16x128xf32>
    %cst_72 = arith.constant 9.99999996E-13 : f32
    %167 = vector.broadcast %cst_72 : f32 to vector<16x1xf32>
    %168 = arith.addf %164, %167 : vector<16x1xf32>
    %169 = math.rsqrt %168 : vector<16x1xf32>
    %170 = vector.broadcast %169 : vector<16x1xf32> to vector<16x128xf32>
    %171 = arith.mulf %166, %170 : vector<16x128xf32>
    %172 = vector.broadcast %145 : vector<1x128xf32> to vector<16x128xf32>
    %173 = arith.mulf %171, %172 : vector<16x128xf32>
    %174 = vector.broadcast %147 : vector<1x128xf32> to vector<16x128xf32>
    %175 = arith.addf %173, %174 : vector<16x128xf32>
    %176 = vector.shape_cast %175 : vector<16x128xf32> to vector<2x8x128xf32>
    %c0_73 = arith.constant 0 : index
    %c0_74 = arith.constant 0 : index
    %c0_75 = arith.constant 0 : index
    %177 = vector.load %arg18[%c0_73, %c0_74, %c0_75] : memref<2x8x128xf32, #tpu.memory_space<vmem>>, vector<2x8x128xf32>
    tpu.vector_store %arg18[%c0_73, %c0_74, %c0_75], %176 {strides = array<i32>} : memref<2x8x128xf32, #tpu.memory_space<vmem>>, vector<2x8x128xf32>,
    return
  }
  func.func @transform_0(%arg0: i32, %arg1: i32) -> (i32, i32, i32) {
    %c0_i32 = arith.constant 0 : i32
    %c0_i32_0 = arith.constant 0 : i32
    %c0_i32_1 = arith.constant 0 : i32
    return %arg0, %c0_i32, %c0_i32_0 : i32, i32, i32
  }
  func.func @transform_1(%arg0: i32, %arg1: i32) -> (i32, i32, i32) {
    %c0_i32 = arith.constant 0 : i32
    %c0_i32_0 = arith.constant 0 : i32
    %c0_i32_1 = arith.constant 0 : i32
    return %arg0, %c0_i32, %c0_i32_0 : i32, i32, i32
  }
  func.func @transform_2(%arg0: i32, %arg1: i32) -> (i32, i32) {
    %c0_i32 = arith.constant 0 : i32
    %c0_i32_0 = arith.constant 0 : i32
    %c0_i32_1 = arith.constant 0 : i32
    return %c0_i32, %c0_i32_0 : i32, i32
  }
  func.func @transform_3(%arg0: i32, %arg1: i32) -> (i32, i32) {
    %c0_i32 = arith.constant 0 : i32
    %c0_i32_0 = arith.constant 0 : i32
    %c0_i32_1 = arith.constant 0 : i32
    return %c0_i32, %c0_i32_0 : i32, i32
  }
  func.func @transform_4(%arg0: i32, %arg1: i32) -> (i32, i32, i32) {
    %c0_i32 = arith.constant 0 : i32
    %c0_i32_0 = arith.constant 0 : i32
    %c0_i32_1 = arith.constant 0 : i32
    return %arg1, %c0_i32, %c0_i32_0 : i32, i32, i32
  }
  func.func @transform_5(%arg0: i32, %arg1: i32) -> (i32, i32, i32) {
    %c0_i32 = arith.constant 0 : i32
    %c0_i32_0 = arith.constant 0 : i32
    %c0_i32_1 = arith.constant 0 : i32
    return %arg1, %c0_i32, %c0_i32_0 : i32, i32, i32
  }
  func.func @transform_6(%arg0: i32, %arg1: i32) -> (i32, i32, i32) {
    %c0_i32 = arith.constant 0 : i32
    %c0_i32_0 = arith.constant 0 : i32
    %c0_i32_1 = arith.constant 0 : i32
    return %arg1, %c0_i32, %c0_i32_0 : i32, i32, i32
  }
  func.func @transform_7(%arg0: i32, %arg1: i32) -> (i32, i32, i32) {
    %c0_i32 = arith.constant 0 : i32
    %c0_i32_0 = arith.constant 0 : i32
    %c0_i32_1 = arith.constant 0 : i32
    return %arg1, %c0_i32, %c0_i32_0 : i32, i32, i32
  }
  func.func @transform_8(%arg0: i32, %arg1: i32) -> (i32, i32, i32) {
    %c0_i32 = arith.constant 0 : i32
    %c0_i32_0 = arith.constant 0 : i32
    %c0_i32_1 = arith.constant 0 : i32
    return %arg1, %c0_i32, %c0_i32_0 : i32, i32, i32
  }
  func.func @transform_9(%arg0: i32, %arg1: i32) -> (i32, i32, i32) {
    %c0_i32 = arith.constant 0 : i32
    %c0_i32_0 = arith.constant 0 : i32
    %c0_i32_1 = arith.constant 0 : i32
    return %arg1, %c0_i32, %c0_i32_0 : i32, i32, i32
  }
  func.func @transform_10(%arg0: i32, %arg1: i32) -> (i32, i32, i32) {
    %c0_i32 = arith.constant 0 : i32
    %c0_i32_0 = arith.constant 0 : i32
    %c0_i32_1 = arith.constant 0 : i32
    return %arg1, %c0_i32, %c0_i32_0 : i32, i32, i32
  }
  func.func @transform_11(%arg0: i32, %arg1: i32) -> (i32, i32, i32) {
    %c0_i32 = arith.constant 0 : i32
    %c0_i32_0 = arith.constant 0 : i32
    %c0_i32_1 = arith.constant 0 : i32
    return %arg1, %c0_i32, %c0_i32_0 : i32, i32, i32
  }
  func.func @transform_12(%arg0: i32, %arg1: i32) -> (i32, i32, i32) {
    %c0_i32 = arith.constant 0 : i32
    %c0_i32_0 = arith.constant 0 : i32
    %c0_i32_1 = arith.constant 0 : i32
    return %arg1, %c0_i32, %c0_i32_0 : i32, i32, i32
  }
  func.func @transform_13(%arg0: i32, %arg1: i32) -> (i32, i32, i32) {
    %c0_i32 = arith.constant 0 : i32
    %c0_i32_0 = arith.constant 0 : i32
    %c0_i32_1 = arith.constant 0 : i32
    return %arg1, %c0_i32, %c0_i32_0 : i32, i32, i32
  }
  func.func @transform_14(%arg0: i32, %arg1: i32) -> (i32, i32, i32) {
    %c0_i32 = arith.constant 0 : i32
    %c0_i32_0 = arith.constant 0 : i32
    %c0_i32_1 = arith.constant 0 : i32
    return %arg1, %c0_i32, %c0_i32_0 : i32, i32, i32
  }
  func.func @transform_15(%arg0: i32, %arg1: i32) -> (i32, i32, i32) {
    %c0_i32 = arith.constant 0 : i32
    %c0_i32_0 = arith.constant 0 : i32
    %c0_i32_1 = arith.constant 0 : i32
    return %arg1, %c0_i32, %c0_i32_0 : i32, i32, i32
  }
  func.func @transform_16(%arg0: i32, %arg1: i32) -> (i32, i32, i32) {
    %c0_i32 = arith.constant 0 : i32
    %c0_i32_0 = arith.constant 0 : i32
    %c0_i32_1 = arith.constant 0 : i32
    return %arg0, %c0_i32, %c0_i32_0 : i32, i32, i32
  }
}

</mosaic_0001>

<bundles_post_ra>
// kernel: contrastive_pretrain_forward.3
= control target key start
LH: loop header
LB: loop body
LE: loop exit
PB: predicated region body
PF: predicated region fallthrough
CT: control target
= control target key end

     0   :  { %vm81_vm0 = vcmask 7168   ;;  %v506_v3 = vmov 0   ;;  %v507_v30 = vmov 0.0   ;;  %s631_s0 = inlined_call_operand.vmem [shape: f32[4,8,128], index: 0, kind: input, shape index: {}]   ;;  %s632_s1 = inlined_call_operand.vmem [shape: f32[4,8,1], index: 1, kind: input, shape index: {}]   ;;  %s633_s2 = inlined_call_operand.vmem [shape: s32[1,4], index: 2, kind: input, shape index: {}]   ;;  %s634_s3 = inlined_call_operand.vmem [shape: s32[4,1], index: 3, kind: input, shape index: {}]   ;;  %s635_s4 = inlined_call_operand.vmem [shape: bf16[128,128], index: 4, kind: input, shape index: {}]   ;;  %s636_s5 = inlined_call_operand.vmem [shape: f32[1,128], index: 5, kind: input, shape index: {}]   ;;  %s637_s6 = inlined_call_operand.hbm [shape: f32[1,1], index: 6, kind: output, shape index: {}]  }
   0x1   :  { %v29_v0 = vld [vmem:[%s632_s1] sm:$0xff]  ;;  %v31_v1 = vld [vmem:[%s632_s1 + $0x10] sm:$0xff]  ;;  %v30_v2 = vld [vmem:[%s632_s1 + $0x8] sm:$0xff]  ;;  %454 = vset.pattern.permute.xlu0 %v506_v3  ;;  %455 = vset.pattern.permute.xlu1 %v506_v3 }
   0x2   :  { %v82_v4 = vsel %vm81_vm0, %v29_v0, 0.0  ;;  %v96_v5 = vsel %vm81_vm0, %v31_v1, 0.0  ;;  %v89_v6 = vsel %vm81_vm0, %v30_v2, 0.0  ;;  %v32_v7 = vld [vmem:[%s632_s1 + $0x18] sm:$0xff]  ;;  %35 = vperm.xlu0 %454, %v29_v0   ;;  %45 = vperm.xlu1 %455, %v31_v1   ;;  %v456_v28 = vld [vmem:[%s635_s4] sm:$0xff]  }
   0x3   :  { %v83_v8 = vrot.slane %v82_v4, 4  ;;  %v97_v9 = vrot.slane %v96_v5, 4  ;;  %v90_v10 = vrot.slane %v89_v6, 4  ;;  %v103_v11 = vsel %vm81_vm0, %v32_v7, 0.0  ;;  %422 = vmatprep.subr.bf16.mxu0 %v507_v30  ;;  %442 = vmatprep.subr.bf16.mxu1 %v507_v30 }
   0x4   :  { %v104_v12 = vrot.slane %v103_v11, 4 }
   0x5   :  { %v84_v13 = vadd.f32 %v83_v8, %v82_v4  ;;  %v98_v14 = vadd.f32 %v97_v9, %v96_v5  ;;  %v91_v15 = vadd.f32 %v90_v10, %v89_v6 }
   0x6   :  { %v105_v16 = vadd.f32 %v104_v12, %v103_v11  ;;  %40 = vperm.xlu0 %454, %v30_v2   ;;  %50 = vperm.xlu1 %455, %v32_v7  }
   0x7   :  { %v85_v17 = vrot.slane %v84_v13, 2  ;;  %v99_v18 = vrot.slane %v98_v14, 2  ;;  %v92_v19 = vrot.slane %v91_v15, 2 }
   0x8   :  { %v106_v20 = vrot.slane %v105_v16, 2 }
   0x9   :  { %v86_v21 = vadd.f32 %v85_v17, %v84_v13  ;;  %v100_v22 = vadd.f32 %v99_v18, %v98_v14  ;;  %v93_v23 = vadd.f32 %v92_v19, %v91_v15 }
   0xa   :  { %v107_v24 = vadd.f32 %v106_v20, %v105_v16 }
   0xb   :  { %v87_v25 = vrot.slane %v86_v21, 1  ;;  %v101_v26 = vrot.slane %v100_v22, 1  ;;  %v94_v27 = vrot.slane %v93_v23, 1 }
   0xc   :  { %v108_v29 = vrot.slane %v107_v24, 1 }
   0xd   :  { %11 = vsyncpa [#allocation3], 0  ;;  %v88_v31 = vadd.f32 %v87_v25, %v86_v21  ;;  %v102_v32 = vadd.f32 %v101_v26, %v100_v22  ;;  %v95_v33 = vadd.f32 %v94_v27, %v93_v23  ;;  %423 = vmatpush3.bf16.msra.mxu0 %v456_v28  ;;  %v457_v34 = vld [vmem:[%s635_s4 + $0x8] sm:$0xff]   ;;  %v458_v40 = vld [vmem:[%s635_s4 + $0x10] sm:$0xff]   ;;  %vm508_vm1 = vmmov 0  }
   0xe   :  { %v109_v35 = vadd.f32 %v108_v29, %v107_v24  ;;  %424 = vmatprep.subr.bf16.mxu0 %v507_v30  ;;  %v459_v41 = vld [vmem:[%s635_s4 + $0x18] sm:$0xff]   ;;  %v460_v42 = vld [vmem:[%s635_s4 + $0x20] sm:$0xff]   ;;  %v461_v47 = vld [vmem:[%s635_s4 + $0x28] sm:$0xff]   ;;  %438 = vmatprep.mubr.msk.bf16.mxu0 %vm508_vm1, %v507_v30  ;;  %vm177_vm2 = vcmask 1041409   ;;  %vm179_vm3 = vcmask 1042434   ;;  %vm181_vm4 = vcmask 1043459  }
   0xf   :  { %v110_v36 = vmax.f32 %v88_v31, 1e-09  ;;  %v112_v37 = vmax.f32 %v102_v32, 1e-09  ;;  %v111_v38 = vmax.f32 %v95_v33, 1e-09  ;;  %444 = vmatprep.mubr.msk.bf16.mxu1 %vm508_vm1, %v507_v30 }
  0x10   :  { %v113_v39 = vmax.f32 %v109_v35, 1e-09  ;;  %v462_v48 = vld [vmem:[%s635_s4 + $0x30] sm:$0xff]   ;;  %v463_v49 = vld [vmem:[%s635_s4 + $0x38] sm:$0xff]   ;;  %v25_v50 = vld [vmem:[%s631_s0] sm:$0xff]  ;;  %vm275_vm5 = vcmask 1043456  }
  0x11   :  { %464 = vrcp.f32 %v110_v36  ;;  %425 = vmatpush3.bf16.msra.mxu0 %v457_v34  ;;  %v27_v54 = vld [vmem:[%s631_s0 + $0x10] sm:$0xff]  ;;  %v26_v55 = vld [vmem:[%s631_s0 + $0x8] sm:$0xff]  ;;  %v28_v56 = vld [vmem:[%s631_s0 + $0x18] sm:$0xff]  ;;  %vm324_vm6 = vcmask 27648   ;;  %vm369_vm9 = vcmask 3072   ;;  %vm383_vm10 = vcmask 0  }
  0x12   :  { %466 = vrcp.f32 %v112_v37  ;;  %426 = vmatprep.subr.bf16.mxu0 %v507_v30 }
  0x13   :  { %468 = vrcp.f32 %v111_v38 }
  0x14   :  { %470 = vrcp.f32 %v113_v39 }
  0x15   :  { %427 = vmatpush3.bf16.msra.mxu0 %v458_v40 }
  0x16   :  { %428 = vmatprep.subr.bf16.mxu0 %v507_v30 }
  0x19   :  { %429 = vmatpush3.bf16.msra.mxu0 %v459_v41 }
  0x1a   :  { %430 = vmatprep.subr.bf16.mxu0 %v507_v30 }
  0x1b   :  { %v465_v43 = vpop.eup %464 }
  0x1c   :  { %v467_v44 = vpop.eup %466  ;;  %120 = vperm.xlu0 %454, %v465_v43   ;;  %v399_v43 = vld [vmem:[%s636_s5] ss:$0 sm:$0xff] }
  0x1d   :  { %v469_v45 = vpop.eup %468  ;;  %431 = vmatpush3.bf16.msra.mxu0 %v460_v42 }
  0x1e   :  { %125 = vperm.xlu1 %455, %v469_v45   ;;  %432 = vmatprep.subr.bf16.mxu0 %v507_v30  ;;  %v471_v46 = vpop.eup %470 }
  0x20   :  { %130 = vperm.xlu0 %454, %v467_v44  }
  0x21   :  { %433 = vmatpush3.bf16.msra.mxu0 %v461_v47 }
  0x22   :  { %135 = vperm.xlu1 %455, %v471_v46   ;;  %434 = vmatprep.subr.bf16.mxu0 %v507_v30 }
  0x25   :  { %435 = vmatpush3.bf16.msra.mxu0 %v462_v48 }
  0x26   :  { %436 = vmatprep.subr.bf16.mxu0 %v507_v30 }
  0x29   :  { %437 = vmatpush3.bf16.msra.mxu0 %v463_v49 }
  0x81   :  { %v36_v51 = vpop.permute.xlu0 %35  ;;  %v46_v52 = vpop.permute.xlu1 %45 }
  0x82   :  { %v53_v53 = vmul.f32 %v36_v51, %v25_v50  ;;  %v55_v58 = vmul.f32 %v46_v52, %v27_v54 }
  0x84   :  { %v57_v57 = vrot.slane %v53_v53, 4  ;;  %v69_v1 = vrot.slane %v55_v58, 4 }
  0x85   :  { %v41_v59 = vpop.permute.xlu0 %40  ;;  %v51_v60 = vpop.permute.xlu1 %50 }
  0x86   :  { %v54_v61 = vmul.f32 %v41_v59, %v26_v55  ;;  %v56_v62 = vmul.f32 %v51_v60, %v28_v56  ;;  %v58_v0 = vadd.f32 %v57_v57, %v53_v53  ;;  %v70_v5 = vadd.f32 %v69_v1, %v55_v58 }
  0x87   :  { %v329_v1 = vlaneseq }
  0x88   :  { %v63_v63 = vrot.slane %v54_v61, 4  ;;  %v75_v3 = vrot.slane %v56_v62, 4  ;;  %v59_v4 = vrot.slane %v58_v0, 2  ;;  %v71_v8 = vrot.slane %v70_v5, 2 }
  0x8a   :  { %v64_v2 = vadd.f32 %v63_v63, %v54_v61  ;;  %v76_v7 = vadd.f32 %v75_v3, %v56_v62  ;;  %v60_v9 = vadd.f32 %v59_v4, %v58_v0  ;;  %v72_v13 = vadd.f32 %v71_v8, %v70_v5 }
  0x8b   :  { %v330_v3 = vshrl.u32 %v329_v1, 7  ;;  %v332_v4 = vand.u32 127, %v329_v1 }
  0x8c   :  { %v65_v6 = vrot.slane %v64_v2, 2  ;;  %v77_v10 = vrot.slane %v76_v7, 2  ;;  %v61_v12 = vrot.slane %v60_v9, 1  ;;  %v73_v17 = vrot.slane %v72_v13, 1 }
  0x8d   :  { %vm333_vm7 = vcmp.ne.s32.totalorder %v330_v3, %v332_v4 }
  0x8e   :  { %v66_v11 = vadd.f32 %v65_v6, %v64_v2  ;;  %v78_v15 = vadd.f32 %v77_v10, %v76_v7  ;;  %v62_v16 = vadd.f32 %v61_v12, %v60_v9  ;;  %v74_v25 = vadd.f32 %v73_v17, %v72_v13  ;;  %v336_v9 = vld [vmem:[%s634_s3] sm:$0xf] }
  0x8f   :  { %v408_v5 = vsel %vm333_vm7, 1.0, %v507_v30 }
  0x90   :  { %v67_v14 = vrot.slane %v66_v11, 1  ;;  %v79_v21 = vrot.slane %v78_v15, 1 }
  0x92   :  { %v68_v19 = vadd.f32 %v67_v14, %v66_v11  ;;  %v80_v28 = vadd.f32 %v79_v21, %v78_v15  ;;  %v409_v11 = vld [vmem:[%s633_s2] ss:$0 sm:$0xff]  ;;  %s509_s2 = smov [#allocation2]  }
  0x93   :  { %s391_s3 = sshll.u32 %s509_s2, 4  ;;  %s392_s3 = int_to_ptr.vmem [resolvable:$true] %s391_s3 }
  0x94   :  { %s482_s7 = scalar_lea.vmem %s392_s3, 16  ;;  %s486_s8 = scalar_lea.vmem %s392_s3, 32 }
  0x95   :  { %p483_p0 = scmp.ne.s32.totalorder %s392_s3, %s482_s7  ;;  %p487_p1 = scmp.lt.s32.totalorder %s392_s3, %s392_s3 }
  0x96   :  { %p488_p2 = scmp.lt.s32.totalorder %s486_s8, %s482_s7 }
  0x98   :  { %p489_p3 = por %p488_p2, %p487_p1 }
  0x9a   :  { %p490_p4 = pnand %p489_p3, %p483_p0 }
  0x9b   :  { %v121_v18 = vpop.permute.xlu0 %120 }
  0x9c   :  { %v138_v20 = vmul.f32 %v121_v18, %v62_v16 }
  0x9d   :  { %v126_v22 = vpop.permute.xlu1 %125 }
  0x9e   :  { %v139_v23 = vmul.f32 %v126_v22, %v68_v19  ;;  %v142_v24 = vpack.c.bf16 %v138_v20, %v138_v20 }
  0x9f   :  { %v131_v26 = vpop.permute.xlu0 %130 }
  0xa0   :  { %v143_v27 = vpack.c.bf16 %v139_v23, %v139_v23  ;;  %v140_v29 = vmul.f32 %v131_v26, %v74_v25  ;;  %v173_v31 = vunpack.c.l.b16 %v142_v24 }
  0xa1   :  { %v136_v32 = vpop.permute.xlu1 %135 }
  0xa2   :  { %v174_v33 = vunpack.c.l.b16 %v143_v27  ;;  %v141_v34 = vmul.f32 %v136_v32, %v80_v28  ;;  %v144_v35 = vpack.c.bf16 %v140_v29, %v140_v29 }
  0xa4   :  { %v145_v36 = vpack.c.bf16 %v141_v34, %v141_v34  ;;  %v175_v37 = vunpack.c.l.b16 %v144_v35  ;;  %v178_v38 = vsel %vm177_vm2, %v174_v33, %v173_v31 }
  0xa6   :  { %v176_v39 = vunpack.c.l.b16 %v145_v36  ;;  %v180_v40 = vsel %vm179_vm3, %v175_v37, %v178_v38 }
  0xa8   :  { %v182_v41 = vsel %vm181_vm4, %v176_v39, %v180_v40 }
  0xa9   :  { %v183_v42 = vpack.c.b16 %v182_v41, %v182_v41 }
  0xab   :  { %439 = vmatmul.mubr.bf16.vlgmr.msra.gmra.mrb[0].mxu0 %v183_v42 }
 0x17e   :  { %v267_v44 = vpop.f32.mrb[0].mxu0 }
 0x17f   :  { %v268_v45 = vadd.f32 %v399_v43, %v267_v44  ;;  %v440_v46 = vpop.f32.mrb[1].mxu0 }
 0x180   :  { %v270_v47 = vpop.f32.mrb[2].mxu0 }
 0x181   :  { %472 = vtanh.f32 %v268_v45  ;;  %v441_v48 = vpop.f32.mrb[3].mxu0 }
 0x18b   :  { %v473_v49 = vpop.eup %472 }
 0x18c   :  { %v274_v50 = vmul.f32 %v473_v49, %v473_v49 }
 0x18e   :  { %v276_v51 = vsel %vm275_vm5, %v274_v50, 0.0 }
 0x18f   :  { %277 = vadd.xlane.f32.xlu0 %v276_v51 }
 0x21c   :  { %v278_v52 = vpop.xlane.xlu0 %277 }
 0x21d   :  { %v279_v53 = vmax.f32 %v278_v52, 1e-24 }
 0x21f   :  { %474 = vrsqrt.f32 %v279_v53 }
 0x229   :  { %v475_v54 = vpop.eup %474 }
 0x22a   :  { %v281_v55 = vmul.f32 %v475_v54, %v473_v49 }
 0x22c   :  { %v282_v56 = vpack.c.bf16 %v281_v55, %v281_v55 }
 0x22e   :  { %443 = vmatpush3.bf16.xpose.msra.mxu1 %v282_v56 }
 0x235   :  { %445 = vmatmul.mubr.bf16.vlgmr.msra.gmra.mrb[0].mxu1 %v282_v56 }
 0x308   :  { %v317_v57 = vpop.f32.mrb[0].mxu1 }
 0x309   :  { %v323_v58 = vmul.f32 14.285714, %v317_v57  ;;  %v446_v59 = vpop.f32.mrb[1].mxu1 }
 0x30a   :  { %v320_v60 = vpop.f32.mrb[2].mxu1 }
 0x30b   :  { %v447_v61 = vpop.f32.mrb[3].mxu1  ;;  %v325_v62 = vsel %vm324_vm6, %v323_v58, -inf }
 0x30c   :  { %326 = vmax.xlane.f32.xlu1 %v325_v62 }
 0x399   :  { %v327_v63 = vpop.xlane.xlu1 %326 }
 0x39a   :  { %v328_v0 = vsub.f32 %v323_v58, %v327_v63 }
 0x39c   :  { %v349_v2 = vmul.f32 1.442695, %v328_v0 }
 0x39e   :  { %476 = vpow2.f32 %v349_v2 }
 0x3a8   :  { %v477_v6 = vpop.eup %476 }
 0x3a9   :  { %v351_v7 = vmul.f32 %v477_v6, %v408_v5 }
 0x3ab   :  { %v352_v8 = vsel %vm324_vm6, %v351_v7, 0.0 }
 0x3ac   :  { %353 = vadd.xlane.f32.xlu0 %v352_v8 }
 0x3c2   :  { %339 = vperm.xlu0 %454, %v336_v9  }
 0x439   :  { %v354_v10 = vpop.xlane.xlu0 %353 }
 0x43a   :  { %478 = vlog2.f32 %v354_v10 }
 0x441   :  { %v340_v12 = vpop.permute.xlu0 %339 }
 0x442   :  { %vm345_vm8 = vcmp.eq.s32.totalorder %v340_v12, %v409_v11 }
 0x443   :  { %v410_v13 = vsel %vm345_vm8, 1.0, %v507_v30 }
 0x444   :  { %v479_v14 = vpop.eup %478  ;;  %v348_v15 = vmul.f32 %v410_v13, %v408_v5 }
 0x445   :  { %v356_v16 = vmul.f32 0.6931472, %v479_v14 }
 0x446   :  { %v358_v17 = vsel %vm324_vm6, %v348_v15, 0.0 }
 0x447   :  { %359 = vadd.xlane.f32.xlu1 %v358_v17  ;;  %v357_v18 = vsub.f32 %v328_v0, %v356_v16 }
 0x449   :  { %v362_v19 = vmul.f32 %v357_v18, %v348_v15 }
 0x44b   :  { %v363_v20 = vsel %vm324_vm6, %v362_v19, 0.0 }
 0x44c   :  { %364 = vadd.xlane.f32.xlu1 %v363_v20 }
 0x4d4   :  { %v360_v21 = vpop.xlane.xlu1 %359 }
 0x4d5   :  { %v361_v22 = vmax.f32 %v360_v21, 1.0 }
 0x4d7   :  { %480 = vrcp.f32 %v361_v22 }
 0x4d9   :  { %v365_v24 = vpop.xlane.xlu1 %364 }
 0x4e1   :  { %v481_v23 = vpop.eup %480 }
 0x4e2   :  { %v367_v25 = vmul.f32 %v481_v23, %v365_v24 }
 0x4e4   :  { %v368_v26 = vmul.f32 -1.0, %v367_v25 }
 0x4e6   :  { %v370_v30 = vsel %vm369_vm9, %v368_v26, 0.0 }
 0x4e7   :  { %371 = vadd.xlane.f32.xlu1 %v370_v30 }
 0x574   :  { %v372_v27 = vpop.xlane.xlu1 %371 }
 0x575   :  { %v373_v28 = vrot.slane %v372_v27, 4 }
 0x577   :  { %v374_v29 = vadd.f32 %v373_v28, %v372_v27 }
 0x579   :  { %v375_v31 = vrot.slane %v374_v29, 2 }
 0x57b   :  { %v376_v32 = vadd.f32 %v375_v31, %v374_v29 }
 0x57d   :  { %v377_v33 = vrot.slane %v376_v32, 1 }
 0x57f   :  { %v378_v34 = vadd.f32 %v377_v33, %v376_v32 }
 0x581   :  { %448 = vpush %v378_v34 }
 0x5b2   :  { %s449_s30 = spop %448 }
 0x5b3   :  { %v380_v35 = vstv %s449_s30 }
 0x5b4   :  { %v382_v36 = vmul.f32 0.25, %v380_v35 }
 0x5b6   :  { %384 = vst.msk [vmem:[#allocation2] sm:$0x1] %vm383_vm10, %v382_v36 }
 0x5b7   :  { %493 = shalt.err (!%p490_p4)
}
 0x5b8   :  { %s494_s11 = scalar_lea.hbm %s637_s6, 16 }
 0x5b9   :  { %p495_p5 = scmp.ne.s32.totalorder %s637_s6, %s494_s11  ;;  %p498_p6 = scmp.lt.u32.totalorder %s494_s11, %s637_s6 }
 0x5bb   :  { %p500_p7 = pnand %p498_p6, %p495_p5 }
 0x5bd   :  { %503 = shalt.err (!%p500_p7)
}
 0x5be   :  { %394 = dma.vmem_to_hbm [thread:$0]  %s392_s3, 16, %s637_s6, [#allocation3]  }
 0x5bf   :  { %504 = dma.done.wait [#allocation3], 16  }
 0x5c0   :  { %505 = vsyncadd [#allocation3], 4294967280 }
 0x5c1   :  { %398 = vsyncpa [#allocation3], 1 }

// kernel: contrastive_pretrain_forward.2
= control target key start
LH: loop header
LB: loop body
LE: loop exit
PB: predicated region body
PF: predicated region fallthrough
CT: control target
= control target key end

     0   :  { %s3503_s0 = inlined_call_operand.vmem [shape: f32[4,8,128], index: 0, kind: input, shape index: {}]   ;;  %s3504_s1 = inlined_call_operand.vmem [shape: f32[4,1,8], index: 1, kind: input, shape index: {}]   ;;  %s3505_s2 = inlined_call_operand.vmem [shape: f32[1,128], index: 2, kind: input, shape index: {}]   ;;  %s3506_s3 = inlined_call_operand.vmem [shape: f32[1,128], index: 3, kind: input, shape index: {}]   ;;  %s3507_s4 = inlined_call_operand.vmem [shape: bf16[2,128,384], index: 4, kind: input, shape index: {}]   ;;  %s3508_s5 = inlined_call_operand.vmem [shape: f32[2,1,384], index: 5, kind: input, shape index: {}]   ;;  %s3509_s6 = inlined_call_operand.hbm [shape: bf16[2,128,128], index: 6, kind: input, shape index: {}]   ;;  %s3510_s7 = inlined_call_operand.vmem [shape: f32[2,1,128], index: 7, kind: input, shape index: {}]   ;;  %s3511_s8 = inlined_call_operand.vmem [shape: f32[2,1,128], index: 8, kind: input, shape index: {}]   ;;  %s3512_s9 = inlined_call_operand.vmem [shape: f32[2,1,128], index: 9, kind: input, shape index: {}]   ;;  %s3513_s10 = inlined_call_operand.hbm [shape: bf16[2,128,128], index: 10, kind: input, shape index: {}]   ;;  %s3514_s11 = inlined_call_operand.vmem [shape: f32[2,1,128], index: 11, kind: input, shape index: {}]   ;;  %s3515_s12 = inlined_call_operand.hbm [shape: bf16[2,128,128], index: 12, kind: input, shape index: {}]   ;;  %s3516_s13 = inlined_call_operand.vmem [shape: f32[2,1,128], index: 13, kind: input, shape index: {}]   ;;  %s3517_s14 = inlined_call_operand.vmem [shape: f32[2,1,128], index: 14, kind: input, shape index: {}]   ;;  %s3518_s15 = inlined_call_operand.vmem [shape: f32[2,1,128], index: 15, kind: input, shape index: {}]   ;;  %s3519_s16 = inlined_call_operand.vmem [shape: f32[4,8,128], index: 16, kind: output, shape index: {}]  }
   0x1   :  { %3533 = sst [smem:[#allocation17_spill]] %s3503_s0 }
   0x2   :  { %3534 = sst [smem:[#allocation18_spill]] %s3504_s1 }
   0x3   :  { %3535 = sst [smem:[#allocation19_spill]] %s3505_s2 }
   0x4   :  { %3536 = sst [smem:[#allocation20_spill]] %s3506_s3 }
   0x5   :  { %3537 = sst [smem:[#allocation21_spill]] %s3507_s4 }
   0x6   :  { %3538 = sst [smem:[#allocation22_spill]] %s3508_s5 }
   0x7   :  { %3539 = sst [smem:[#allocation23_spill]] %s3509_s6 }
   0x8   :  { %3540 = sst [smem:[#allocation24_spill]] %s3510_s7 }
   0x9   :  { %3541 = sst [smem:[#allocation25_spill]] %s3511_s8 }
   0xa   :  { %3542 = sst [smem:[#allocation26_spill]] %s3513_s10 }
   0xb   :  { %3543 = sst [smem:[#allocation27_spill]] %s3514_s11 }
   0xc   :  { %3544 = sst [smem:[#allocation28_spill]] %s3515_s12 }
   0xd   :  { %3545 = sst [smem:[#allocation29_spill]] %s3516_s13 }
   0xe   :  { %3546 = sst [smem:[#allocation30_spill]] %s3517_s14 }
   0xf   :  { %3547 = sst [smem:[#allocation31_spill]] %s3518_s15 }
  0x10   :  { %3548 = sst [smem:[#allocation32_spill]] %s3519_s16 }
  0x11   :  { %21 = vsyncpa [#allocation3], 0 }
  0x12   :  { %23 = vsyncpa [#allocation3 + $0x1], 0 }
  0x13   :  { %24 = vsyncpa [#allocation5], 0 }
  0x14   :  { %26 = vsyncpa [#allocation5 + $0x1], 0  ;;  %s2969_s21 = smov 0   ;;  %s2971_s22 = smov 0  }
  0x15   :  { %s2973_s23 = smov 0   ;;  %s2975_s24 = smov 0  }
  0x16   :  { %s2977_s25 = smov 0   ;;  %s2979_s26 = smov 0  }
  0x17   :  { %s2981_s27 = smov 0   ;;  %s2983_s28 = smov 0  }
  0x18 LB: > { %3549 = sst [smem:[#allocation9_spill]] %s2848_s22  ;;  %s3521_s29 = sadd.s32 4294967295, %s2872_s28   ;;  %s2872_s28 = sphi %s2983_s28, %s32_s28   ;;  %s2868_s27 = sphi %s2981_s27, %s3602_s27   ;;  %s2864_s26 = sphi %s2979_s26, %s3601_s26   ;;  %s2860_s25 = sphi %s2977_s25, %s3600_s25   ;;  %s2856_s24 = sphi %s2975_s24, %s3599_s24   ;;  %s2852_s23 = sphi %s2973_s23, %s3598_s23   ;;  %s2848_s22 = sphi %s2971_s22, %s3597_s22   ;;  %s2844_s21 = sphi %s2969_s21, %s3596_s21  }
  0x19   : > { %3550 = sst [smem:[#allocation10_spill]] %s2852_s23  ;;  %s41_s30 = sadd.s32 1, %s2864_s26 }
  0x1a   : > { %3551 = sst [smem:[#allocation11_spill]] %s2864_s26  ;;  %p42_p0 = scmp.ge.s32.totalorder %s41_s30, 2 }
  0x1b   : > { %3552 = sst [smem:[#allocation12_spill]] %s2868_s27  ;;  %s44_s0 = sadd.s32 1, %s2868_s27 }
  0x1c   : > { %3553 = sst [smem:[#allocation13_spill]] %s2872_s28  ;;  %s197_s17 = sadd.s32 1, %s2852_s23 }
  0x1d   : > { %p204_p1 = scmp.ne.s32.totalorder %s2852_s23, %s2848_s22  ;;  %s3604_s30 = smov (%p42_p0, %s41_s30), 0 }
  0x1e   : > { %3554 = sst [smem:[#allocation14_spill]] %s3604_s30  ;;  %s3606_s0 = smov (!%p42_p0, %s44_s0), %s2868_s27 }
  0x1f   : > { %s194_s18 = ssub.s32 %s2864_s26, %s3604_s30  ;;  %p205_p2 = scmp.eq.s32.totalorder %s2872_s28, 0 }
  0x20   : > { %p46_p3 = scmp.ge.s32.totalorder %s3606_s0, 2  ;;  %p195_p4 = scmp.eq.s32.totalorder %s194_s18, 0 }
  0x21   : > { %p206_p5 = por %p205_p2, %p204_p1  ;;  %p210_p6 = scmp.ne.s32.totalorder %s2848_s22, %s2844_s21 }
  0x22   : > { %s3608_s0 = smov (%p46_p3, %s3606_s0), 0  ;;  %p211_p7 = scmp.eq.s32.totalorder %s3521_s29, 0 }
  0x23   : > { %3555 = sst [smem:[#allocation15_spill]] %s3608_s0  ;;  %p2558_p8 = scmp.lt.s32.totalorder %s2872_s28, 4 }
  0x24   : > { %s3023_s19 = scalar_select %p195_p4, %s2852_s23, %s197_s17  }
  0x25   : > { %s3523_s20 = sand.u32 1, %s2852_s23   ;;  %p3029_p9 = por %p211_p7, %p210_p6 }
  0x26   : > { %3556 = sst [smem:[#allocation16_spill]] %s3023_s19  ;;  %s3035_s30 = sshll.u32 %s3523_s20, 6 }
  0x27   : > { %s3557_s3 = scalar_select %p3029_p9, 1, 0 }
  0x28   : > { %s3038_s18 = sshll.u32 %s2864_s26, 10  ;;  %p3040_p10 = pnand %p2558_p8, %p206_p5 }
  0x29   : > { %s571_s17 = sand.u32 1, %s2872_s28   ;;  %s3559_s10 = sld [smem:[#allocation26_spill]] }
  0x2a   : > { %s575_s20 = scalar_lea.vmem [#allocation4], %s3035_s30  ;;  %s3055_s26 = scalar_lea.sflag [#allocation5], %s571_s17 }
  0x2b   : > { %s582_s19 = sshll.u32 %s575_s20, 4  ;;  %p3061_p13 = pneg %p3040_p10  ;;  %s3052_s19 = int_to_ptr.vmem [resolvable:$true] %s582_s19 }
  0x2f   : > { %s3049_s27 = scalar_lea.hbm %s3559_s10, %s3038_s18  ;;  %s2717_s20 = scalar_lea.hbm %s3559_s10, 2048 }
  0x30   : > { %s2712_s2 = scalar_lea.hbm %s3049_s27, 1024  ;;  %p2718_p2 = scmp.lt.u32.totalorder %s3049_s27, %s3559_s10 }
  0x31   : > { %p2713_p12 = scmp.ne.s32.totalorder %s3049_s27, %s2712_s2  ;;  %p2719_p3 = scmp.lt.u32.totalorder %s2717_s20, %s2712_s2 }
  0x32   : > { %p2721_p5 = scmp.lt.u32.totalorder %s2712_s2, %s3049_s27 }
  0x33   : > { %p2715_p0 = pnand %p3061_p13, %p2713_p12  ;;  %p2720_p4 = por %p2719_p3, %p2718_p2 }
  0x35   : > { %p2716_p1 = pneg %p2715_p0  ;;  %p2722_p6 = por %p2721_p5, %p2720_p4 }
  0x37   : > { %p2723_p7 = pnand %p2722_p6, %p2716_p1 }
  0x39   : > { %2726 = shalt.err (!%p2723_p7)
}
  0x3a   : > { %s2727_s17 = scalar_lea.vmem %s3052_s19, 1024  ;;  %s2874_s29 = smov [#allocation4]  }
  0x3b   : > { %p2728_p8 = scmp.ne.s32.totalorder %s3052_s19, %s2727_s17  ;;  %s2732_s0 = sshll.u32 %s2874_s29, 4  ;;  %s2733_s0 = int_to_ptr.vmem [resolvable:$false] %s2732_s0 }
  0x3c   : > { %s2734_s14 = scalar_lea.vmem %s2733_s0, 2048  ;;  %p2735_p11 = scmp.lt.s32.totalorder %s3052_s19, %s2733_s0 }
  0x3d   : > { %p2730_p12 = pnand %p2728_p8, %p3061_p13  ;;  %p2736_p9 = scmp.lt.s32.totalorder %s2734_s14, %s2727_s17 }
  0x3f   : > { %p2731_p0 = pneg %p2730_p12  ;;  %p2737_p2 = por %p2736_p9, %p2735_p11 }
  0x41   : > { %p2738_p3 = pnand %p2737_p2, %p2731_p0 }
  0x43   : > { %2741 = shalt.err (!%p2738_p3)
}
  0x44   : > { %s3526_s2 = smov 64   ;;  %s3528_s15 = smov 4  }
  0x45   : > { %2554 = dma.hbm_to_vmem [thread:$0]  (!%p3040_p10), %s3049_s27, 1024, %s3052_s19, %s3055_s26, %s3526_s2, %s3526_s2, %s3528_s15  }
  0x46   : > { %p635_p9 = scmp.lt.s32.totalorder %s2872_s28, 5  ;;  %p3561_p11 = scmp.ge.s32.totalorder %s2872_s28, 1 }
  0x47   : > { %s3563_s6 = sld [smem:[#allocation23_spill]]  ;;  %s536_s14 = scalar_lea.vmem [#allocation2], %s3035_s30 }
  0x48   : > { %p3091_p1 = pnand %p3561_p11, %p635_p9  ;;  %s543_s10 = sshll.u32 %s536_s14, 4  ;;  %s3102_s10 = int_to_ptr.vmem [resolvable:$true] %s543_s10 }
  0x49   : > { %s3564_s27 = sand.u32 1, %s2852_s23  }
  0x4a   : > { %s3562_s20 = scalar_select %p3091_p1, 1, 0 }
  0x4b   : > { %s3106_s19 = scalar_lea.sflag [#allocation3], %s3564_s27 }
  0x4d   : > { %s3099_s0 = scalar_lea.hbm %s3563_s6, %s3038_s18  ;;  %s2747_s29 = scalar_lea.hbm %s3563_s6, 2048 }
  0x4e   : > { %s2742_s2 = scalar_lea.hbm %s3099_s0, 1024  ;;  %p2748_p7 = scmp.lt.u32.totalorder %s3099_s0, %s3563_s6 }
  0x4f   : > { %p2743_p4 = scmp.ne.s32.totalorder %s3099_s0, %s2742_s2  ;;  %p2749_p8 = scmp.lt.u32.totalorder %s2747_s29, %s2742_s2 }
  0x50   : > { %p2751_p0 = scmp.lt.u32.totalorder %s2742_s2, %s3099_s0 }
  0x51   : > { %p2745_p5 = pnand %p2743_p4, %p3061_p13  ;;  %p2750_p12 = por %p2749_p8, %p2748_p7 }
  0x53   : > { %p2746_p6 = pneg %p2745_p5  ;;  %p2752_p2 = por %p2751_p0, %p2750_p12 }
  0x55   : > { %p2753_p3 = pnand %p2752_p2, %p2746_p6 }
  0x57   : > { %2756 = shalt.err (!%p2753_p3)
}
  0x58   : > { %s2757_s14 = scalar_lea.vmem %s3102_s10, 1024  ;;  %s2877_s15 = smov [#allocation2]  }
  0x59   : > { %p2758_p9 = scmp.ne.s32.totalorder %s3102_s10, %s2757_s14  ;;  %s2762_s27 = sshll.u32 %s2877_s15, 4  ;;  %s2763_s27 = int_to_ptr.vmem [resolvable:$false] %s2762_s27 }
  0x5a   : > { %s2764_s11 = scalar_lea.vmem %s2763_s27, 2048  ;;  %p2765_p5 = scmp.lt.s32.totalorder %s3102_s10, %s2763_s27 }
  0x5b   : > { %p2760_p11 = pnand %p2758_p9, %p3061_p13  ;;  %p2766_p1 = scmp.lt.s32.totalorder %s2764_s11, %s2757_s14 }
  0x5d   : > { %p2761_p4 = pneg %p2760_p11  ;;  %p2767_p7 = por %p2766_p1, %p2765_p5 }
  0x5f   : > { %p2768_p8 = pnand %p2767_p7, %p2761_p4 }
  0x61   : > { %2771 = shalt.err (!%p2768_p8)
}
  0x62   : > { %s3565_s13 = smov 4   ;;  %s3566_s2 = smov 64  }
  0x63   : > { %2551 = dma.hbm_to_vmem [thread:$0]  (!%p3040_p10), %s3099_s0, 1024, %s3102_s10, %s3106_s19, %s3566_s2, %s3566_s2, %s3565_s13  }
  0x64   : > { %s3567_s12 = sld [smem:[#allocation28_spill]]  ;;  %s602_s14 = scalar_lea.vmem [#allocation6], %s3035_s30 }
  0x65   : > { %s609_s27 = sshll.u32 %s602_s14, 4  ;;  %s3140_s27 = int_to_ptr.vmem [resolvable:$true] %s609_s27 }
  0x6a   : > { %s3137_s15 = scalar_lea.hbm %s3567_s12, %s3038_s18  ;;  %s2777_s0 = scalar_lea.hbm %s3567_s12, 2048 }
  0x6b   : > { %s2772_s11 = scalar_lea.hbm %s3137_s15, 1024  ;;  %p2778_p0 = scmp.lt.u32.totalorder %s3137_s15, %s3567_s12 }
  0x6c   : > { %p2773_p1 = scmp.ne.s32.totalorder %s3137_s15, %s2772_s11  ;;  %p2779_p2 = scmp.lt.u32.totalorder %s2777_s0, %s2772_s11 }
  0x6d   : > { %p2781_p9 = scmp.lt.u32.totalorder %s2772_s11, %s3137_s15 }
  0x6e   : > { %p2775_p6 = pnand %p2773_p1, %p3061_p13  ;;  %p2780_p3 = por %p2779_p2, %p2778_p0 }
  0x70   : > { %p2776_p12 = pneg %p2775_p6  ;;  %p2782_p11 = por %p2781_p9, %p2780_p3 }
  0x72   : > { %p2783_p4 = pnand %p2782_p11, %p2776_p12 }
  0x74   : > { %2786 = shalt.err (!%p2783_p4)
}
  0x75   : > { %s2787_s30 = scalar_lea.vmem %s3140_s27, 1024  ;;  %s2878_s6 = smov [#allocation6]  }
  0x76   : > { %p2788_p5 = scmp.ne.s32.totalorder %s3140_s27, %s2787_s30  ;;  %s2792_s17 = sshll.u32 %s2878_s6, 4  ;;  %s2793_s17 = int_to_ptr.vmem [resolvable:$false] %s2792_s17 }
  0x77   : > { %s2794_s29 = scalar_lea.vmem %s2793_s17, 2048  ;;  %p2795_p1 = scmp.lt.s32.totalorder %s3140_s27, %s2793_s17 }
  0x78   : > { %p2790_p7 = pnand %p2788_p5, %p3061_p13  ;;  %p2796_p6 = scmp.lt.s32.totalorder %s2794_s29, %s2787_s30 }
  0x7a   : > { %p2791_p8 = pneg %p2790_p7  ;;  %p2797_p0 = por %p2796_p6, %p2795_p1 }
  0x7c   : > { %p2798_p2 = pnand %p2797_p0, %p2791_p8 }
  0x7e   : > { %2801 = shalt.err (!%p2798_p2)
}
  0x7f   : > { %2557 = dma.hbm_to_vmem [thread:$0]  (!%p3040_p10), %s3137_s15, 1024, %s3140_s27, %s3055_s26, %s3566_s2, %s3566_s2, %s3565_s13  }
  0x80   : > { %p3568_p13 = scmp.ne.s32.totalorder %s3562_s20, 0 }
  0x81   : > { %s641_s16 = sand.u32 (!%p3568_p13), 1, %s2848_s22   ;;  %p3569_p12 = scmp.ne.s32.totalorder (!%p3568_p13), %s3557_s3, 0 }
  0x82   : > { %639 = sbr.rel (%p3568_p13) target bundleno = 3543 (0xdd7), region = 84  ;;  %s3170_s14 = sshll.u32 (!%p3568_p13), %s641_s16, 6 }
  0x83   : > { %s642_s11 = scalar_lea.sflag (!%p3568_p13), [#allocation3], %s641_s16 }
  0x89   : > { %2835 = dma.done.wait (%p3569_p12), %s642_s11, 1024  }
  0x8a   : > { %2837 = vsyncadd (%p3569_p12), %s642_s11, 4294966272  ;;  %s3570_s21 = sadd.s32 4294967295, %s2872_s28   ;;  %s3180_s13 = scalar_lea.vmem [#allocation4], %s3170_s14 }
  0x8b   : > { %s650_s26 = sand.u32 1, %s3570_s21  }
  0x8c   : > { %s651_s20 = scalar_lea.sflag [#allocation5], %s650_s26 }
  0x8d   : > { %2839 = dma.done.wait (%p3569_p12), %s651_s20, 2048  }
  0x8e   : > { %2841 = vsyncadd (%p3569_p12), %s651_s20, 4294965248  ;;  %s2296_s2 = sshll.u32 %s2860_s25, 1  ;;  %p772_p3 = scmp.lt.s32.totalorder %s2856_s24, 1 }
  0x8f   : > { %p762_p10 = scmp.lt.s32.totalorder %s2296_s2, 3  ;;  %s3571_s1 = sld [smem:[#allocation18_spill]] }
  0x90   : > { %s3189_s15 = scalar_select %p772_p3, %s2856_s24, 1 }
  0x91   : > { %s3610_s2 = smov (!%p762_p10, %s2296_s2), 3  ;;  %s3572_s30 = sld [smem:[#allocation17_spill]] }
  0x92   : > { %s2297_s3 = sshll.u32 %s3610_s2, 3  ;;  %s2540_s17 = smul.u32 192, %s3189_s15 }
  0x93   : > { %s2541_s29 = smul.u32 3, %s3189_s15  ;;  %s3574_s4 = sld [smem:[#allocation21_spill]] }
  0x94   : > { %s3576_s5 = sld [smem:[#allocation22_spill]]  ;;  %s3577_s21 = sld [smem:[#allocation27_spill]] }
  0x95   : > { %s3194_s25 = scalar_lea.vmem %s3571_s1, %s3610_s2  ;;  %s3578_s20 = sld [smem:[#allocation29_spill]] }
  0x96   : > { %s3579_s23 = sld [smem:[#allocation30_spill]]  ;;  %s3581_s18 = sld [smem:[#allocation32_spill]] }
  0x97   : > { %s765_s6 = scalar_lea.vmem %s3572_s30, %s2297_s3  ;;  %s3245_s1 = scalar_lea.vmem [#allocation6], %s3170_s14 }
  0x98   : > { %p2302_p9 = scmp.ne.s32.totalorder %s2856_s24, 0 }
  0x99   : > { %s3208_s10 = scalar_lea.vmem %s3574_s4, %s2540_s17  ;;  %v813_v0 = vld [vmem:[%s765_s6] sm:$0xff] (!%p2302_p9)  ;;  %v814_v1 = vld [vmem:[%s765_s6 + $0x8] sm:$0xff] (!%p2302_p9)  ;;  %v817_v2 = vlaneseq (!%p2302_p9)  ;;  %v2879_v6 = vmov (!%p2302_p9), 0.0   ;;  %s3582_s8 = sld [smem:[#allocation19_spill]] (!%p2302_p9) }
  0x9a   : > { %s3217_s19 = scalar_lea.vmem %s3576_s5, %s2541_s29  ;;  %s792_s22 = scalar_lea.vmem %s3577_s21, %s3189_s15  ;;  %822 = vadd.xlane.f32.xlu0 (!%p2302_p9), %v813_v0 }
  0x9b   : > { %s795_s4 = scalar_lea.vmem %s3578_s20, %s3189_s15  ;;  %s3580_s29 = sld [smem:[#allocation31_spill]]  ;;  %v818_v3 = vand.u32 (!%p2302_p9), 127, %v817_v2 }
  0x9c   : > { %s798_s2 = scalar_lea.vmem %s3579_s23, %s3189_s15  ;;  %s3242_s30 = scalar_lea.vmem %s3581_s18, %s2297_s3 }
  0x9d   : > { %812 = sbr.rel (%p2302_p9) target bundleno = 472 (0x1d8), region = 100  ;;  %vm819_vm0 = vcmp.lt.s32.totalorder (!%p2302_p9), %v818_v3, 32  ;;  %s3583_s3 = sld [smem:[#allocation20_spill]] (!%p2302_p9) }
  0x9e   : > { %824 = vadd.xlane.f32.xlu0 (!%p2302_p9), %v814_v1  ;;  %v2303_v7 = vsel (!%p2302_p9), %vm819_vm0, 1.0, %v2879_v6 }
  0x9f   : > { %v2304_v23 = vld [vmem:[%s3582_s8] ss:$0 sm:$0xff] (!%p2302_p9) }
  0xa1   : > { %s801_s0 = scalar_lea.vmem %s3580_s29, %s3189_s15 }
  0xa3   : > { %v2305_v25 = vld [vmem:[%s3583_s3] ss:$0 sm:$0xff] (!%p2302_p9) }
 0x127   : > { %v823_v4 = vpop.xlane.xlu0 %822 }
 0x128   : > { %v826_v5 = vmul.f32 0.03125, %v823_v4 }
 0x12a   : > { %v828_v8 = vsub.f32 %v813_v0, %v826_v5 }
 0x12b   : > { %v825_v9 = vpop.xlane.xlu0 %824 }
 0x12c   : > { %v827_v10 = vmul.f32 0.03125, %v825_v9  ;;  %v830_v11 = vmul.f32 %v2303_v7, %v828_v8 }
 0x12e   : > { %v829_v12 = vsub.f32 %v814_v1, %v827_v10  ;;  %v832_v13 = vmul.f32 %v830_v11, %v830_v11 }
 0x130   : > { %834 = vadd.xlane.f32.xlu1 %v832_v13  ;;  %v831_v14 = vmul.f32 %v2303_v7, %v829_v12 }
 0x132   : > { %v833_v15 = vmul.f32 %v831_v14, %v831_v14 }
 0x134   : > { %836 = vadd.xlane.f32.xlu1 %v833_v15 }
 0x1bd   : > { %v835_v16 = vpop.xlane.xlu1 %834 }
 0x1be   : > { %v838_v17 = vmul.f32 0.03125, %v835_v16 }
 0x1c0   : > { %v840_v18 = vadd.f32 1e-12, %v838_v17 }
 0x1c1   : > { %v837_v19 = vpop.xlane.xlu1 %836 }
 0x1c2   : > { %2630 = vrsqrt.f32 %v840_v18  ;;  %v839_v20 = vmul.f32 0.03125, %v837_v19 }
 0x1c4   : > { %v841_v21 = vadd.f32 1e-12, %v839_v20 }
 0x1c6   : > { %2632 = vrsqrt.f32 %v841_v21 }
 0x1cc   : > { %v2631_v22 = vpop.eup %2630 }
 0x1cd   : > { %v844_v24 = vmul.f32 %v2631_v22, %v828_v8 }
 0x1cf   : > { %v852_v26 = vmul.f32 %v2304_v23, %v844_v24 }
 0x1d0   : > { %v2633_v27 = vpop.eup %2632 }
 0x1d1   : > { %v860_v28 = vadd.f32 %v2305_v25, %v852_v26  ;;  %v845_v29 = vmul.f32 %v2633_v27, %v829_v12 }
 0x1d3   : > { %862 = vst [vmem:[%s3242_s30] sm:$0xff] %v860_v28  ;;  %v853_v30 = vmul.f32 %v2304_v23, %v845_v29 }
 0x1d5   : > { %v861_v31 = vadd.f32 %v2305_v25, %v853_v30 }
 0x1d7   : > { %863 = vst [vmem:[%s3242_s30 + $0x8] sm:$0xff] %v861_v31 }
 0x1d8 PF: > { %v2634_v32 = vld [vmem:[%s3208_s10 + $0x4] ss:$12 sps:$4 sm:$0xff]   ;;  %v2636_v33 = vld [vmem:[%s3208_s10] ss:$12 sps:$4 sm:$0xff]   ;;  %v2880_v34 = vmov 0   ;;  %v2881_v35 = vmov 0.0   ;;  %v901_v61 = vlaneseq  ;;  %s3590_s23 = scalar_lea.vmem %s3512_s9, %s3189_s15 }
 0x1d9   : > { %1076 = vmatprep.mubr.bf16.mxu0 %v2880_v34  ;;  %2420 = vmatprep.subr.bf16.mxu1 %v2881_v35  ;;  %v2637_v36 = vld [vmem:[%s3208_s10 + $0x1c] ss:$12 sps:$4 sm:$0xff]   ;;  %v2639_v37 = vld [vmem:[%s3208_s10 + $0x18] ss:$12 sps:$4 sm:$0xff]   ;;  %v2640_v38 = vld [vmem:[%s3208_s10 + $0x34] ss:$12 sps:$4 sm:$0xff]  }
 0x1da   : > { %1044 = vmatprep.subr.bf16.mxu0 %v2634_v32  ;;  %v2642_v39 = vld [vmem:[%s3208_s10 + $0x30] ss:$12 sps:$4 sm:$0xff]   ;;  %v2643_v40 = vld [vmem:[%s3208_s10 + $0x4c] ss:$12 sps:$4 sm:$0xff]   ;;  %v2645_v41 = vld [vmem:[%s3208_s10 + $0x48] ss:$12 sps:$4 sm:$0xff]  }
 0x1db   : > { %1045 = vmatpush1.bf16.msra.mxu0 %v2636_v33  ;;  %v2646_v42 = vld [vmem:[%s3208_s10 + $0x64] ss:$12 sps:$4 sm:$0xff]   ;;  %v2658_v43 = vld [vmem:[%s3208_s10 + $0x8] ss:$12 sps:$4 sm:$0xff]   ;;  %v2659_v44 = vld [vmem:[%s3208_s10 + $0x20] ss:$12 sps:$4 sm:$0xff]  }
 0x1dc   : > { %1046 = vmatprep.subr.bf16.mxu0 %v2637_v36  ;;  %2421 = vmatpush3.bf16.msra.mxu1 %v2658_v43  ;;  %v2648_v45 = vld [vmem:[%s3208_s10 + $0x60] ss:$12 sps:$4 sm:$0xff]   ;;  %v2649_v46 = vld [vmem:[%s3208_s10 + $0x7c] ss:$12 sps:$4 sm:$0xff]   ;;  %v2651_v47 = vld [vmem:[%s3208_s10 + $0x78] ss:$12 sps:$4 sm:$0xff]  }
 0x1dd   : > { %2422 = vmatprep.subr.bf16.mxu1 %v2881_v35  ;;  %v2652_v48 = vld [vmem:[%s3208_s10 + $0x94] ss:$12 sps:$4 sm:$0xff]   ;;  %v2660_v49 = vld [vmem:[%s3208_s10 + $0x38] ss:$12 sps:$4 sm:$0xff]   ;;  %v2661_v50 = vld [vmem:[%s3208_s10 + $0x50] ss:$12 sps:$4 sm:$0xff]  }
 0x1de   : > { %v2654_v51 = vld [vmem:[%s3208_s10 + $0x90] ss:$12 sps:$4 sm:$0xff]   ;;  %v2655_v52 = vld [vmem:[%s3208_s10 + $0xac] ss:$12 sps:$4 sm:$0xff]   ;;  %v2662_v53 = vld [vmem:[%s3208_s10 + $0x68] ss:$12 sps:$4 sm:$0xff]  }
 0x1df   : > { %1047 = vmatpush1.bf16.msra.mxu0 %v2639_v37  ;;  %v2657_v54 = vld [vmem:[%s3208_s10 + $0xa8] ss:$12 sps:$4 sm:$0xff]   ;;  %v3282_v55 = vld [vmem:[%s3242_s30] sm:$0xff]  ;;  %v2665_v60 = vld [vmem:[%s3208_s10 + $0xb0] ss:$12 sps:$4 sm:$0xff]   ;;  %vm2882_vm1 = vmmov 0  }
 0x1e0   : > { %1048 = vmatprep.subr.bf16.mxu0 %v2640_v38  ;;  %2423 = vmatpush3.bf16.msra.mxu1 %v2659_v44  ;;  %v3285_v56 = vld [vmem:[%s3242_s30 + $0x8] sm:$0xff]  ;;  %v2664_v59 = vld [vmem:[%s3208_s10 + $0x98] ss:$12 sps:$4 sm:$0xff]   ;;  %v902_v62 = vshrl.u32 %v901_v61, 7  ;;  %v899_v0 = vld [vmem:[%s3217_s19] sm:$0x7] }
 0x1e1   : > { %2424 = vmatprep.subr.bf16.mxu1 %v2881_v35  ;;  %v2663_v57 = vld [vmem:[%s3208_s10 + $0x80] ss:$12 sps:$4 sm:$0xff]   ;;  %v866_v58 = vpack.c.bf16 %v3285_v56, %v3282_v55  ;;  %2436 = vmatprep.mubr.msk.bf16.mxu1 %vm2882_vm1, %v2881_v35  ;;  %vm1137_vm2 = vcmask 130048   ;;  %vm1274_vm3 = vcmask 1043456   ;;  %vm1246_vm4 = vcmask 64512   ;;  %s2883_s10 = smov 112  }
 0x1e2   : > { %v907_v63 = vsub.s32 1, %v902_v62  ;;  %v903_v2 = vsub.s32 0, %v902_v62  ;;  %v911_v18 = vsub.s32 2, %v902_v62  ;;  %v3330_v31 = vld [vmem:[%s3194_s25] ss:$0 sm:$0xff]  ;;  %s3586_s19 = sld [smem:[#allocation24_spill]] }
 0x1e3   : > { %1049 = vmatpush1.bf16.msra.mxu0 %v2642_v39  ;;  %v3333_v37 = vld [vmem:[%s3194_s25 + $0x1] ss:$0 sm:$0xff]  ;;  %s3584_s25 = scalar_lea.vmem [#allocation2], %s3170_s14  ;;  %s3588_s17 = sld [smem:[#allocation25_spill]] }
 0x1e4   : > { %1050 = vmatprep.subr.bf16.mxu0 %v2643_v40  ;;  %2425 = vmatpush3.bf16.msra.mxu1 %v2660_v49  ;;  %v908_v1 = vrot.slane %v899_v0, %v907_v63  ;;  %v904_v8 = vrot.slane %v899_v0, %v903_v2  ;;  %v912_v19 = vrot.slane %v899_v0, %v911_v18  ;;  %v2666_v0 = vld [vmem:[%s3584_s25] sm:$0xff]   ;;  %s3585_s6 = smov %s3584_s25 }
 0x1e5   : > { %2426 = vmatprep.subr.bf16.mxu1 %v2881_v35 }
 0x1e7   : > { %1051 = vmatpush1.bf16.msra.mxu0 %v2645_v41 }
 0x1e8   : > { %1052 = vmatprep.subr.bf16.mxu0 %v2646_v42  ;;  %2427 = vmatpush3.bf16.msra.mxu1 %v2661_v50  ;;  %s3587_s16 = scalar_lea.vmem %s3586_s19, %s3189_s15 }
 0x1e9   : > { %2428 = vmatprep.subr.bf16.mxu1 %v2881_v35  ;;  %s3589_s20 = scalar_lea.vmem %s3588_s17, %s3189_s15 }
 0x1eb   : > { %1053 = vmatpush1.bf16.msra.mxu0 %v2648_v45 }
 0x1ec   : > { %1054 = vmatprep.subr.bf16.mxu0 %v2649_v46  ;;  %2429 = vmatpush3.bf16.msra.mxu1 %v2662_v53 }
 0x1ed   : > { %2430 = vmatprep.subr.bf16.mxu1 %v2881_v35 }
 0x1ef   : > { %1055 = vmatpush1.bf16.msra.mxu0 %v2651_v47 }
 0x1f0   : > { %1056 = vmatprep.subr.bf16.mxu0 %v2652_v48  ;;  %2431 = vmatpush3.bf16.msra.mxu1 %v2663_v57 }
 0x1f1   : > { %2432 = vmatprep.subr.bf16.mxu1 %v2881_v35 }
 0x1f3   : > { %1057 = vmatpush1.bf16.msra.mxu0 %v2654_v51 }
 0x1f4   : > { %1058 = vmatprep.subr.bf16.mxu0 %v2655_v52  ;;  %2433 = vmatpush3.bf16.msra.mxu1 %v2664_v59 }
 0x1f5   : > { %2434 = vmatprep.subr.bf16.mxu1 %v2881_v35 }
 0x1f7   : > { %1059 = vmatpush1.bf16.msra.mxu0 %v2657_v54 }
 0x1f8   : > { %2440 = vmatprep.subr.bf16.mxu0 %v2881_v35  ;;  %2435 = vmatpush3.bf16.msra.mxu1 %v2665_v60 }
 0x1f9   : > { %2446 = vmatprep.subr.bf16.mxu1 %v2881_v35 }
 0x1fa   : > { %1077 = vmatmul.mubr.bf16.vlgmr.msra.gmra.mrb[0].mxu0 %v866_v58 }
 0x1fb   : > { %2442 = vmatprep.mubr.msk.bf16.mxu0 %vm2882_vm1, %v2881_v35  ;;  %2437 = vmatmul.mubr.bf16.vlgmr.msra.gmra.mrb[0].mxu1 %v866_v58 }
 0x1fc   : > { %2448 = vmatprep.mubr.msk.bf16.mxu1 %vm2882_vm1, %v2881_v35 }
 0x2cd   : > { %v1078_v3 = vpop.f32.mrb[0].mxu0 }
 0x2ce   : > { %v1080_v4 = vpop.f32.mrb[1].mxu0  ;;  %v1079_v13 = vadd.f32 %v1078_v3, %v904_v8  ;;  %v1121_v20 = vpop.f32.mrb[0].mxu1 }
 0x2cf   : > { %v1081_v5 = vadd.f32 %v1080_v4, %v908_v1  ;;  %v1082_v6 = vpop.f32.mrb[2].mxu0  ;;  %v1122_v21 = vadd.f32 %v1121_v20, %v912_v19  ;;  %v2438_v22 = vpop.f32.mrb[1].mxu1 }
 0x2d0   : > { %v1084_v7 = vpop.f32.mrb[3].mxu0  ;;  %v1083_v15 = vadd.f32 %v1082_v6, %v904_v8  ;;  %v1131_v16 = vpack.c.bf16 %v1079_v13, %v1079_v13  ;;  %v1124_v23 = vpop.f32.mrb[2].mxu1 }
 0x2d1   : > { %v1133_v9 = vpack.c.bf16 %v1081_v5, %v1081_v5  ;;  %v1085_v10 = vadd.f32 %v1084_v7, %v908_v1  ;;  %v3319_v24 = vpack.c.bf16 %v1122_v21, %v1122_v21  ;;  %v1125_v25 = vadd.f32 %v1124_v23, %v912_v19  ;;  %v2439_v26 = vpop.f32.mrb[3].mxu1 }
 0x2d2   : > { %v1132_v17 = vpack.c.bf16 %v1083_v15, %v1083_v15 }
 0x2d3   : > { %v1142_v11 = vsel %vm1137_vm2, %v1133_v9, 0  ;;  %v3307_v12 = vpack.c.bf16 %v1085_v10, %v1085_v10  ;;  %v1276_v27 = vsel %vm1274_vm3, %v3319_v24, 0  ;;  %v3323_v28 = vpack.c.bf16 %v1125_v25, %v1125_v25 }
 0x2d4   : > { %2441 = vmatpush3.bf16.xpose.msra.mxu0 %v1142_v11 }
 0x2d5   : > { %v1188_v14 = vsel %vm1137_vm2, %v3307_v12, 0  ;;  %2452 = vmatprep.subr.bf16.mxu0 %v2881_v35  ;;  %v1322_v29 = vsel %vm1274_vm3, %v3323_v28, 0 }
 0x2d6   : > { %2447 = vmatpush3.bf16.xpose.msra.mxu1 %v1188_v14 }
 0x2d7   : > { %2458 = vmatprep.subr.bf16.mxu1 %v2881_v35 }
 0x2db   : > { %2443 = vmatmul.mubr.msk.bf16.vlgmr.msra.gmra.mrb[4].mxu0 %vm1137_vm2, %v1131_v16 }
 0x2dc   : > { %2454 = vmatprep.mubr.msk.bf16.mxu0 %vm2882_vm1, %v2881_v35  ;;  %2453 = vmatpush3.bf16.msra.mxu0 %v1276_v27 }
 0x2dd   : > { %2449 = vmatmul.mubr.msk.bf16.vlgmr.msra.gmra.mrb[4].mxu1 %vm1137_vm2, %v1132_v17  ;;  %2464 = vmatprep.subr.bf16.mxu0 %v2881_v35 }
 0x2de   : > { %2460 = vmatprep.mubr.msk.bf16.mxu1 %vm2882_vm1, %v2881_v35  ;;  %2459 = vmatpush3.bf16.msra.mxu1 %v1322_v29 }
 0x2df   : > { %2470 = vmatprep.subr.bf16.mxu1 %v2881_v35 }
 0x3ae   : > { %v1178_v30 = vpop.f32.mrb[4].mxu0 }
 0x3af   : > { %v1230_v32 = vmul.f32 0.25, %v1178_v30  ;;  %v2444_v33 = vpop.f32.mrb[5].mxu0 }
 0x3b0   : > { %v1181_v34 = vpop.f32.mrb[6].mxu0  ;;  %v1224_v36 = vpop.f32.mrb[4].mxu1 }
 0x3b1   : > { %v1231_v38 = vmul.f32 0.25, %v1224_v36  ;;  %v2445_v39 = vpop.f32.mrb[7].mxu0  ;;  %v2450_v40 = vpop.f32.mrb[5].mxu1  ;;  %v1244_v41 = vadd.f32 %v3330_v31, %v1230_v32 }
 0x3b2   : > { %v1227_v42 = vpop.f32.mrb[6].mxu1 }
 0x3b3   : > { %v2451_v43 = vpop.f32.mrb[7].mxu1  ;;  %v1247_v44 = vsel %vm1246_vm4, %v1244_v41, -inf  ;;  %v1245_v45 = vadd.f32 %v3333_v37, %v1231_v38 }
 0x3b4   : > { %1248 = vmax.xlane.f32.xlu0 %v1247_v44 }
 0x3b5   : > { %v1250_v46 = vsel %vm1246_vm4, %v1245_v45, -inf }
 0x3b8   : > { %1251 = vmax.xlane.f32.xlu0 %v1250_v46 }
 0x3ce   : > { %1429 = vrot.lane.b32.xlu0 %v1133_v9, %s2883_s10 }
 0x441   : > { %v1249_v47 = vpop.xlane.xlu0 %1248 }
 0x442   : > { %v1253_v48 = vsub.f32 %v1244_v41, %v1249_v47 }
 0x444   : > { %v1255_v49 = vmul.f32 1.442695, %v1253_v48 }
 0x445   : > { %v1252_v50 = vpop.xlane.xlu0 %1251 }
 0x446   : > { %2684 = vpow2.f32 %v1255_v49  ;;  %v1254_v51 = vsub.f32 %v1245_v45, %v1252_v50 }
 0x448   : > { %v1257_v52 = vmul.f32 1.442695, %v1254_v51 }
 0x449   : > { %v1430_v4 = vpop.permute.xlu0 %1429 }
 0x44a   : > { %2686 = vpow2.f32 %v1257_v52  ;;  %v1435_v6 = vsel %vm1137_vm2, %v1430_v4, 0 }
 0x450   : > { %v2685_v53 = vpop.eup %2684 }
 0x451   : > { %v1259_v54 = vsel %vm1246_vm4, %v2685_v53, 0.0 }
 0x452   : > { %1260 = vadd.xlane.f32.xlu1 %v1259_v54 }
 0x454   : > { %v2687_v57 = vpop.eup %2686 }
 0x455   : > { %v1262_v58 = vsel %vm1246_vm4, %v2687_v57, 0.0 }
 0x456   : > { %1263 = vadd.xlane.f32.xlu1 %v1262_v58 }
 0x467   : > { %1481 = vrot.lane.b32.xlu1 %v3307_v12, %s2883_s10 }
 0x46b   : > { %1426 = vrot.lane.b32.xlu1 %v1131_v16, %s2883_s10 }
 0x46f   : > { %1478 = vrot.lane.b32.xlu1 %v1132_v17, %s2883_s10 }
 0x4df   : > { %v1261_v59 = vpop.xlane.xlu1 %1260 }
 0x4e0   : > { %2688 = vrcp.f32 %v1261_v59 }
 0x4e3   : > { %v1264_v60 = vpop.xlane.xlu1 %1263 }
 0x4e4   : > { %2690 = vrcp.f32 %v1264_v60 }
 0x4e7   : > { %v1482_v7 = vpop.permute.xlu1 %1481 }
 0x4e8   : > { %v1487_v17 = vsel %vm1137_vm2, %v1482_v7, 0 }
 0x4ea   : > { %v2689_v62 = vpop.eup %2688 }
 0x4eb   : > { %v1267_v63 = vmul.f32 %v2689_v62, %v2685_v53  ;;  %v1427_v8 = vpop.permute.xlu1 %1426 }
 0x4ed   : > { %v1269_v1 = vpack.c.bf16 %v1267_v63, %v1267_v63 }
 0x4ee   : > { %v2691_v2 = vpop.eup %2690 }
 0x4ef   : > { %v1268_v3 = vmul.f32 %v2691_v2, %v2687_v57  ;;  %2455 = vmatmul.mubr.msk.bf16.vlgmr.msra.gmra.mrb[8].mxu0 %vm1246_vm4, %v1269_v1  ;;  %v1479_v22 = vpop.permute.xlu1 %1478 }
 0x4f0   : > { %2465 = vmatpush3.bf16.msra.mxu0 %v2666_v0  ;;  %2466 = vmatprep.mubr.msk.bf16.mxu0 %vm2882_vm1, %v2881_v35  ;;  %v2667_v0 = vld [vmem:[%s3585_s6 + $0x8] sm:$0xff]  }
 0x4f1   : > { %v1270_v5 = vpack.c.bf16 %v1268_v3, %v1268_v3  ;;  %2476 = vmatprep.subr.bf16.mxu0 %v2881_v35 }
 0x4f3   : > { %2461 = vmatmul.mubr.msk.bf16.vlgmr.msra.gmra.mrb[8].mxu1 %vm1246_vm4, %v1270_v5 }
 0x4f4   : > { %2471 = vmatpush3.bf16.xpose.msra.mxu1 %v1435_v6  ;;  %2472 = vmatprep.mubr.msk.bf16.mxu1 %vm2882_vm1, %v2881_v35 }
 0x4f5   : > { %2482 = vmatprep.subr.bf16.mxu1 %v2881_v35 }
 0x4fb   : > { %2473 = vmatmul.mubr.msk.bf16.vlgmr.msra.gmra.mrb[12].mxu1 %vm1137_vm2, %v1427_v8 }
 0x4fc   : > { %2484 = vmatprep.mubr.msk.bf16.mxu1 %vm2882_vm1, %v2881_v35 }
 0x5c2   : > { %v1312_v9 = vpop.f32.mrb[8].mxu0 }
 0x5c3   : > { %v2456_v10 = vpop.f32.mrb[9].mxu0 }
 0x5c4   : > { %v1315_v11 = vpop.f32.mrb[10].mxu0  ;;  %v2338_v10 = vld [vmem:[%s3587_s16] ss:$0 sm:$0xff] }
 0x5c5   : > { %v2457_v12 = vpop.f32.mrb[11].mxu0 }
 0x5c6   : > { %v1358_v13 = vpop.f32.mrb[8].mxu1 }
 0x5c7   : > { %v1364_v14 = vpack.c.bf16 %v1358_v13, %v1312_v9  ;;  %v2462_v15 = vpop.f32.mrb[9].mxu1 }
 0x5c8   : > { %v1361_v16 = vpop.f32.mrb[10].mxu1 }
 0x5c9   : > { %v2463_v18 = vpop.f32.mrb[11].mxu1  ;;  %2467 = vmatmul.mubr.msk.bf16.vlgmr.msra.gmra.mrb[12].mxu0 %vm1137_vm2, %v1364_v14 }
 0x5ca   : > { %2477 = vmatpush3.bf16.xpose.msra.mxu0 %v1487_v17  ;;  %2478 = vmatprep.mubr.msk.bf16.mxu0 %vm2882_vm1, %v2881_v35 }
 0x5cb   : > { %2488 = vmatprep.subr.bf16.mxu0 %v2881_v35 }
 0x5ce   : > { %v1471_v19 = vpop.f32.mrb[12].mxu1 }
 0x5cf   : > { %v1529_v20 = vmul.f32 0.25, %v1471_v19  ;;  %v2474_v21 = vpop.f32.mrb[13].mxu1 }
 0x5d0   : > { %v1474_v23 = vpop.f32.mrb[14].mxu1  ;;  %v2668_v21 = vld [vmem:[%s3180_s13] sm:$0xff]  }
 0x5d1   : > { %v2475_v25 = vpop.f32.mrb[15].mxu1  ;;  %2479 = vmatmul.mubr.msk.bf16.vlgmr.msra.gmra.mrb[16].mxu0 %vm1137_vm2, %v1479_v22  ;;  %v1531_v26 = vadd.f32 %v3330_v31, %v1529_v20  ;;  %v2669_v22 = vld [vmem:[%s3180_s13 + $0x8] sm:$0xff]   ;;  %v1715_v23 = vand.u32 127, %v901_v61 }
 0x5d2   : > { %2490 = vmatprep.mubr.msk.bf16.mxu0 %vm2882_vm1, %v2881_v35 }
 0x5d3   : > { %v1533_v27 = vsel %vm1246_vm4, %v1531_v26, -inf  ;;  %vm1716_vm5 = vcmp.lt.s32.totalorder %v1715_v23, 32 }
 0x5d4   : > { %1534 = vmax.xlane.f32.xlu0 %v1533_v27  ;;  %v3407_v27 = vsel %vm1716_vm5, 1.0, %v2881_v35 }
 0x661   : > { %v1535_v29 = vpop.xlane.xlu0 %1534 }
 0x662   : > { %v1539_v30 = vsub.f32 %v1531_v26, %v1535_v29 }
 0x664   : > { %v1541_v32 = vmul.f32 1.442695, %v1539_v30 }
 0x666   : > { %2692 = vpow2.f32 %v1541_v32 }
 0x670   : > { %v2693_v33 = vpop.eup %2692 }
 0x671   : > { %v1545_v34 = vsel %vm1246_vm4, %v2693_v33, 0.0 }
 0x672   : > { %1546 = vadd.xlane.f32.xlu0 %v1545_v34 }
 0x69c   : > { %v1410_v36 = vpop.f32.mrb[12].mxu0 }
 0x69d   : > { %v2468_v38 = vpop.f32.mrb[13].mxu0  ;;  %v1423_v11 = vadd.f32 %v2338_v10, %v1410_v36  ;;  %v2670_v36 = vld [vmem:[%s3180_s13 + $0x10] sm:$0xff]  }
 0x69e   : > { %v1413_v39 = vpop.f32.mrb[14].mxu0  ;;  %v2671_v38 = vld [vmem:[%s3180_s13 + $0x18] sm:$0xff]  }
 0x69f   : > { %v2469_v40 = vpop.f32.mrb[15].mxu0  ;;  %v1424_v13 = vadd.f32 %v2338_v10, %v1413_v39  ;;  %v2672_v39 = vld [vmem:[%s3180_s13 + $0x20] sm:$0xff]  }
 0x6a0   : > { %v2673_v40 = vld [vmem:[%s3180_s13 + $0x28] sm:$0xff]  }
 0x6a4   : > { %v1523_v41 = vpop.f32.mrb[16].mxu0 }
 0x6a5   : > { %v1530_v31 = vmul.f32 0.25, %v1523_v41  ;;  %v2480_v42 = vpop.f32.mrb[17].mxu0  ;;  %v2674_v41 = vld [vmem:[%s3180_s13 + $0x30] sm:$0xff]  }
 0x6a6   : > { %v1526_v43 = vpop.f32.mrb[18].mxu0 }
 0x6a7   : > { %v2481_v44 = vpop.f32.mrb[19].mxu0  ;;  %v1532_v45 = vadd.f32 %v3333_v37, %v1530_v31  ;;  %v2675_v31 = vld [vmem:[%s3180_s13 + $0x38] sm:$0xff]  }
 0x6a9   : > { %v1536_v46 = vsel %vm1246_vm4, %v1532_v45, -inf }
 0x6aa   : > { %1537 = vmax.xlane.f32.xlu1 %v1536_v46 }
 0x6bb   : > { %1607 = vrot.lane.b32.xlu1 %v3323_v28, %s2883_s10 }
 0x6ff   : > { %v1547_v37 = vpop.xlane.xlu0 %1546 }
 0x737   : > { %v1538_v47 = vpop.xlane.xlu1 %1537 }
 0x738   : > { %v1540_v48 = vsub.f32 %v1532_v45, %v1538_v47 }
 0x73a   : > { %v1543_v49 = vmul.f32 1.442695, %v1540_v48 }
 0x73b   : > { %v1608_v50 = vpop.permute.xlu1 %1607 }
 0x73c   : > { %2694 = vpow2.f32 %v1543_v49  ;;  %v1613_v51 = vsel %vm1274_vm3, %v1608_v50, 0  ;;  %v2346_v49 = vld [vmem:[%s3589_s20] ss:$0 sm:$0xff] }
 0x73d   : > { %2489 = vmatpush3.bf16.msra.mxu0 %v1613_v51  ;;  %2696 = vrcp.f32 %v1547_v37  ;;  %v2347_v37 = vld [vmem:[%s3590_s23] ss:$0 sm:$0xff] }
 0x73e   : > { %2500 = vmatprep.subr.bf16.mxu0 %v2881_v35 }
 0x746   : > { %v2695_v52 = vpop.eup %2694 }
 0x747   : > { %v1548_v53 = vsel %vm1246_vm4, %v2695_v52, 0.0  ;;  %v2697_v28 = vpop.eup %2696 }
 0x748   : > { %1549 = vadd.xlane.f32.xlu0 %v1548_v53  ;;  %v1553_v57 = vmul.f32 %v2697_v28, %v2693_v33 }
 0x74a   : > { %v1555_v60 = vpack.c.bf16 %v1553_v57, %v1553_v57 }
 0x75e   : > { %1558 = vrot.lane.b32.xlu0 %v3319_v24, %s2883_s10 }
 0x7d5   : > { %v1550_v54 = vpop.xlane.xlu0 %1549 }
 0x7d6   : > { %2698 = vrcp.f32 %v1550_v54 }
 0x7d9   : > { %v1559_v58 = vpop.permute.xlu0 %1558 }
 0x7da   : > { %v1564_v59 = vsel %vm1274_vm3, %v1559_v58, 0 }
 0x7db   : > { %2483 = vmatpush3.bf16.msra.mxu1 %v1564_v59  ;;  %v2676_v59 = vld [vmem:[%s3245_s1] sm:$0xff]  }
 0x7dc   : > { %2494 = vmatprep.subr.bf16.mxu1 %v2881_v35 }
 0x7de   : > { %2485 = vmatmul.mubr.msk.bf16.vlgmr.msra.gmra.mrb[16].mxu1 %vm1246_vm4, %v1555_v60  ;;  %v2677_v60 = vld [vmem:[%s3245_s1 + $0x8] sm:$0xff]  }
 0x7df   : > { %2496 = vmatprep.mubr.msk.bf16.mxu1 %vm2882_vm1, %v2881_v35  ;;  %2495 = vmatpush3.bf16.msra.mxu1 %v2667_v0  ;;  %v2681_v0 = vld [vmem:[%s3245_s1 + $0x28] sm:$0xff]  }
 0x7e0   : > { %v2699_v24 = vpop.eup %2698  ;;  %2520 = vmatprep.subr.bf16.mxu1 %v2881_v35 }
 0x7e1   : > { %v1554_v62 = vmul.f32 %v2699_v24, %v2695_v52  ;;  %v2678_v24 = vld [vmem:[%s3245_s1 + $0x10] sm:$0xff]  }
 0x7e3   : > { %v1556_v63 = vpack.c.bf16 %v1554_v62, %v1554_v62  ;;  %v2679_v62 = vld [vmem:[%s3245_s1 + $0x18] sm:$0xff]  }
 0x7e5   : > { %2491 = vmatmul.mubr.msk.bf16.vlgmr.msra.gmra.mrb[20].mxu0 %vm1246_vm4, %v1556_v63  ;;  %v2680_v63 = vld [vmem:[%s3245_s1 + $0x20] sm:$0xff]  }
 0x7e6   : > { %2516 = vmatprep.mubr.msk.bf16.mxu0 %vm2882_vm1, %v2881_v35  ;;  %2501 = vmatpush3.bf16.msra.mxu0 %v2668_v21 }
 0x7e7   : > { %2502 = vmatprep.subr.bf16.mxu0 %v2881_v35 }
 0x7ea   : > { %2503 = vmatpush3.bf16.msra.mxu0 %v2669_v22 }
 0x7eb   : > { %2504 = vmatprep.subr.bf16.mxu0 %v2881_v35 }
 0x7ee   : > { %2505 = vmatpush3.bf16.msra.mxu0 %v2670_v36 }
 0x7ef   : > { %2506 = vmatprep.subr.bf16.mxu0 %v2881_v35 }
 0x7f2   : > { %2507 = vmatpush3.bf16.msra.mxu0 %v2671_v38 }
 0x7f3   : > { %2508 = vmatprep.subr.bf16.mxu0 %v2881_v35 }
 0x7f6   : > { %2509 = vmatpush3.bf16.msra.mxu0 %v2672_v39 }
 0x7f7   : > { %2510 = vmatprep.subr.bf16.mxu0 %v2881_v35 }
 0x7fa   : > { %2511 = vmatpush3.bf16.msra.mxu0 %v2673_v40 }
 0x7fb   : > { %2512 = vmatprep.subr.bf16.mxu0 %v2881_v35 }
 0x7fe   : > { %2513 = vmatpush3.bf16.msra.mxu0 %v2674_v41 }
 0x7ff   : > { %2514 = vmatprep.subr.bf16.mxu0 %v2881_v35 }
 0x802   : > { %2515 = vmatpush3.bf16.msra.mxu0 %v2675_v31 }
 0x8b1   : > { %v1600_v1 = vpop.f32.mrb[16].mxu1 }
 0x8b2   : > { %v2486_v2 = vpop.f32.mrb[17].mxu1 }
 0x8b3   : > { %v1603_v3 = vpop.f32.mrb[18].mxu1  ;;  %v2683_v2 = vld [vmem:[%s3245_s1 + $0x38] sm:$0xff]  }
 0x8b4   : > { %v2487_v4 = vpop.f32.mrb[19].mxu1  ;;  %v2348_v3 = vld [vmem:[%s792_s22] ss:$0 sm:$0xff] }
 0x8b8   : > { %v1649_v5 = vpop.f32.mrb[20].mxu0 }
 0x8b9   : > { %v1655_v6 = vpack.c.bf16 %v1649_v5, %v1600_v1  ;;  %v2492_v7 = vpop.f32.mrb[21].mxu0  ;;  %v2682_v1 = vld [vmem:[%s3245_s1 + $0x30] sm:$0xff]  }
 0x8ba   : > { %v1652_v8 = vpop.f32.mrb[22].mxu0 }
 0x8bb   : > { %v2493_v9 = vpop.f32.mrb[23].mxu0  ;;  %2497 = vmatmul.mubr.msk.bf16.vlgmr.msra.gmra.mrb[20].mxu1 %vm1137_vm2, %v1655_v6 }
 0x8bc   : > { %2536 = vmatprep.mubr.msk.bf16.mxu1 %vm2882_vm1, %v2881_v35  ;;  %2521 = vmatpush3.bf16.msra.mxu1 %v2676_v59 }
 0x8bd   : > { %2522 = vmatprep.subr.bf16.mxu1 %v2881_v35 }
 0x8c0   : > { %2523 = vmatpush3.bf16.msra.mxu1 %v2677_v60 }
 0x8c1   : > { %2524 = vmatprep.subr.bf16.mxu1 %v2881_v35 }
 0x8c4   : > { %2525 = vmatpush3.bf16.msra.mxu1 %v2678_v24 }
 0x8c5   : > { %2526 = vmatprep.subr.bf16.mxu1 %v2881_v35 }
 0x8c8   : > { %2527 = vmatpush3.bf16.msra.mxu1 %v2679_v62 }
 0x8c9   : > { %2528 = vmatprep.subr.bf16.mxu1 %v2881_v35 }
 0x8cc   : > { %2529 = vmatpush3.bf16.msra.mxu1 %v2680_v63 }
 0x8cd   : > { %2530 = vmatprep.subr.bf16.mxu1 %v2881_v35 }
 0x8d0   : > { %2531 = vmatpush3.bf16.msra.mxu1 %v2681_v0 }
 0x8d1   : > { %2532 = vmatprep.subr.bf16.mxu1 %v2881_v35 }
 0x8d4   : > { %2533 = vmatpush3.bf16.msra.mxu1 %v2682_v1 }
 0x8d5   : > { %2534 = vmatprep.subr.bf16.mxu1 %v2881_v35 }
 0x8d8   : > { %2535 = vmatpush3.bf16.msra.mxu1 %v2683_v2 }
 0x98e   : > { %v1701_v12 = vpop.f32.mrb[20].mxu1 }
 0x98f   : > { %v1708_v14 = vadd.f32 %v1701_v12, %v1423_v11  ;;  %v2498_v15 = vpop.f32.mrb[21].mxu1 }
 0x990   : > { %v1704_v16 = vpop.f32.mrb[22].mxu1 }
 0x991   : > { %v1709_v17 = vadd.f32 %v1704_v16, %v1424_v13  ;;  %v2499_v18 = vpop.f32.mrb[23].mxu1  ;;  %v1710_v19 = vadd.f32 %v1708_v14, %v3282_v55 }
 0x993   : > { %1719 = vadd.xlane.f32.xlu1 %v1710_v19  ;;  %v1711_v20 = vadd.f32 %v1709_v17, %v3285_v56 }
 0x995   : > { %1721 = vadd.xlane.f32.xlu0 %v1711_v20 }
 0xa20   : > { %v1720_v25 = vpop.xlane.xlu1 %1719 }
 0xa21   : > { %v1723_v26 = vmul.f32 0.03125, %v1720_v25 }
 0xa22   : > { %v1722_v55 = vpop.xlane.xlu0 %1721 }
 0xa23   : > { %v1725_v56 = vsub.f32 %v1710_v19, %v1723_v26  ;;  %v1724_v29 = vmul.f32 0.03125, %v1722_v55 }
 0xa25   : > { %v1726_v30 = vsub.f32 %v1711_v20, %v1724_v29  ;;  %v1727_v32 = vmul.f32 %v3407_v27, %v1725_v56  ;;  %v2357_v29 = vld [vmem:[%s795_s4] ss:$0 sm:$0xff] }
 0xa27   : > { %v1729_v33 = vmul.f32 %v1727_v32, %v1727_v32  ;;  %v1728_v34 = vmul.f32 %v3407_v27, %v1726_v30 }
 0xa29   : > { %1731 = vadd.xlane.f32.xlu0 %v1729_v33  ;;  %v1730_v61 = vmul.f32 %v1728_v34, %v1728_v34 }
 0xa2b   : > { %1733 = vadd.xlane.f32.xlu1 %v1730_v61 }
 0xab6   : > { %v1732_v42 = vpop.xlane.xlu0 %1731 }
 0xab7   : > { %v1735_v43 = vmul.f32 0.03125, %v1732_v42 }
 0xab8   : > { %v1734_v44 = vpop.xlane.xlu1 %1733 }
 0xab9   : > { %v1737_v45 = vadd.f32 1e-12, %v1735_v43  ;;  %v1736_v46 = vmul.f32 0.03125, %v1734_v44 }
 0xabb   : > { %2700 = vrsqrt.f32 %v1737_v45  ;;  %v1738_v47 = vadd.f32 1e-12, %v1736_v46 }
 0xabd   : > { %2702 = vrsqrt.f32 %v1738_v47 }
 0xac5   : > { %v2701_v48 = vpop.eup %2700 }
 0xac6   : > { %v1741_v50 = vmul.f32 %v2701_v48, %v1725_v56 }
 0xac7   : > { %v2703_v51 = vpop.eup %2702 }
 0xac8   : > { %v1742_v52 = vmul.f32 %v2703_v51, %v1726_v30  ;;  %v1749_v53 = vmul.f32 %v2346_v49, %v1741_v50 }
 0xaca   : > { %v1750_v28 = vmul.f32 %v2346_v49, %v1742_v52  ;;  %v3432_v54 = vadd.f32 %v2347_v37, %v1749_v53 }
 0xacc   : > { %v3434_v57 = vadd.f32 %v2347_v37, %v1750_v28 }
 0xace   : > { %v1759_v58 = vpack.c.bf16 %v3434_v57, %v3432_v54 }
 0xad0   : > { %2517 = vmatmul.mubr.bf16.vlgmr.msra.gmra.mrb[24].mxu0 %v1759_v58  ;;  %v2367_v58 = vld [vmem:[%s801_s0] ss:$0 sm:$0xff] }
 0xba3   : > { %v1865_v4 = vpop.f32.mrb[24].mxu0 }
 0xba4   : > { %v1866_v5 = vadd.f32 %v2348_v3, %v1865_v4  ;;  %v2518_v6 = vpop.f32.mrb[25].mxu0 }
 0xba5   : > { %v1868_v7 = vpop.f32.mrb[26].mxu0 }
 0xba6   : > { %v1874_v8 = vmul.f32 0.044715, %v1866_v5  ;;  %v1869_v9 = vadd.f32 %v2348_v3, %v1868_v7  ;;  %v2519_v10 = vpop.f32.mrb[27].mxu0  ;;  %v1872_v22 = vmul.f32 0.5, %v1866_v5 }
 0xba8   : > { %v1876_v11 = vmul.f32 %v1874_v8, %v1866_v5  ;;  %v1875_v12 = vmul.f32 0.044715, %v1869_v9  ;;  %v1873_v23 = vmul.f32 0.5, %v1869_v9 }
 0xbaa   : > { %v1878_v13 = vmul.f32 %v1876_v11, %v1866_v5  ;;  %v1877_v14 = vmul.f32 %v1875_v12, %v1869_v9 }
 0xbac   : > { %v1880_v15 = vadd.f32 %v1878_v13, %v1866_v5  ;;  %v1879_v16 = vmul.f32 %v1877_v14, %v1869_v9 }
 0xbae   : > { %v1882_v35 = vmul.f32 0.7978846, %v1880_v15  ;;  %v1881_v17 = vadd.f32 %v1879_v16, %v1869_v9 }
 0xbb0   : > { %2704 = vtanh.f32 %v1882_v35  ;;  %v1883_v18 = vmul.f32 0.7978846, %v1881_v17 }
 0xbb2   : > { %2706 = vtanh.f32 %v1883_v18 }
 0xbba   : > { %v2705_v19 = vpop.eup %2704 }
 0xbbb   : > { %v1886_v20 = vadd.f32 1.0, %v2705_v19 }
 0xbbc   : > { %v2707_v21 = vpop.eup %2706 }
 0xbbd   : > { %v1887_v25 = vadd.f32 1.0, %v2707_v21  ;;  %v1888_v26 = vmul.f32 %v1886_v20, %v1872_v22 }
 0xbbf   : > { %v1889_v55 = vmul.f32 %v1887_v25, %v1873_v23 }
 0xbc1   : > { %v1890_v56 = vpack.c.bf16 %v1889_v55, %v1888_v26 }
 0xbc3   : > { %2537 = vmatmul.mubr.bf16.vlgmr.msra.gmra.mrb[24].mxu1 %v1890_v56 }
 0xc96   : > { %v1996_v30 = vpop.f32.mrb[24].mxu1 }
 0xc97   : > { %v1997_v32 = vadd.f32 %v2357_v29, %v1996_v30  ;;  %v2538_v33 = vpop.f32.mrb[25].mxu1 }
 0xc98   : > { %v1999_v34 = vpop.f32.mrb[26].mxu1 }
 0xc99   : > { %v2000_v61 = vadd.f32 %v2357_v29, %v1999_v34  ;;  %v2539_v36 = vpop.f32.mrb[27].mxu1  ;;  %v2003_v38 = vadd.f32 %v1997_v32, %v3432_v54 }
 0xc9b   : > { %2007 = vadd.xlane.f32.xlu0 %v2003_v38  ;;  %v2004_v39 = vadd.f32 %v2000_v61, %v3434_v57 }
 0xc9d   : > { %2009 = vadd.xlane.f32.xlu1 %v2004_v39 }
 0xd28   : > { %v2008_v40 = vpop.xlane.xlu0 %2007 }
 0xd29   : > { %v2011_v41 = vmul.f32 0.03125, %v2008_v40 }
 0xd2a   : > { %v2010_v31 = vpop.xlane.xlu1 %2009 }
 0xd2b   : > { %v2013_v42 = vsub.f32 %v2003_v38, %v2011_v41  ;;  %v2012_v43 = vmul.f32 0.03125, %v2010_v31 }
 0xd2d   : > { %v2014_v44 = vsub.f32 %v2004_v39, %v2012_v43  ;;  %v2015_v45 = vmul.f32 %v3407_v27, %v2013_v42 }
 0xd2f   : > { %v2017_v46 = vmul.f32 %v2015_v45, %v2015_v45  ;;  %v2016_v47 = vmul.f32 %v3407_v27, %v2014_v44  ;;  %v2366_v27 = vld [vmem:[%s798_s2] ss:$0 sm:$0xff] }
 0xd31   : > { %2019 = vadd.xlane.f32.xlu0 %v2017_v46  ;;  %v2018_v48 = vmul.f32 %v2016_v47, %v2016_v47 }
 0xd33   : > { %2021 = vadd.xlane.f32.xlu1 %v2018_v48 }
 0xdbe   : > { %v2020_v49 = vpop.xlane.xlu0 %2019 }
 0xdbf   : > { %v2023_v50 = vmul.f32 0.03125, %v2020_v49 }
 0xdc0   : > { %v2022_v51 = vpop.xlane.xlu1 %2021 }
 0xdc1   : > { %v2025_v52 = vadd.f32 1e-12, %v2023_v50  ;;  %v2024_v53 = vmul.f32 0.03125, %v2022_v51 }
 0xdc3   : > { %2708 = vrsqrt.f32 %v2025_v52  ;;  %v2026_v37 = vadd.f32 1e-12, %v2024_v53 }
 0xdc5   : > { %2710 = vrsqrt.f32 %v2026_v37 }
 0xdcd   : > { %v2709_v28 = vpop.eup %2708 }
 0xdce   : > { %v2029_v54 = vmul.f32 %v2709_v28, %v2013_v42 }
 0xdcf   : > { %v2711_v57 = vpop.eup %2710 }
 0xdd0   : > { %v2037_v59 = vmul.f32 %v2366_v27, %v2029_v54  ;;  %v2030_v60 = vmul.f32 %v2711_v57, %v2014_v44 }
 0xdd2   : > { %v2045_v24 = vadd.f32 %v2367_v58, %v2037_v59  ;;  %v2038_v62 = vmul.f32 %v2366_v27, %v2030_v60 }
 0xdd4   : > { %2047 = vst [vmem:[%s3242_s30] sm:$0xff] %v2045_v24  ;;  %v2046_v63 = vadd.f32 %v2367_v58, %v2038_v62 }
 0xdd6   : > { %2048 = vst [vmem:[%s3242_s30 + $0x8] sm:$0xff] %v2046_v63 }
 0xdd7 PF: > { %s3595_s10 = sld [smem:[#allocation13_spill]]  ;;  %s3596_s21 = sld [smem:[#allocation9_spill]] }
 0xdd8   : > { %s3597_s22 = sld [smem:[#allocation10_spill]]  ;;  %s3598_s23 = sld [smem:[#allocation16_spill]] }
 0xdd9   : > { %s3599_s24 = sld [smem:[#allocation11_spill]]  ;;  %s3600_s25 = sld [smem:[#allocation12_spill]] }
 0xdda   : > { %s3601_s26 = sld [smem:[#allocation14_spill]]  ;;  %s3602_s27 = sld [smem:[#allocation15_spill]] }
 0xddd   : > { %s32_s28 = sadd.s32 1, %s3595_s10  }
 0xdde   : > { %p29_p11 = scmp.ge.s32.totalorder %s32_s28, 6  }
 0xde0   :  { %31 = sbr.rel (!%p29_p11) target bundleno = 24 (0x18), region = 185 }
 0xde7   :  { %2071 = vsyncpa [#allocation3], 1 }
 0xde8   :  { %2073 = vsyncpa [#allocation3 + $0x1], 1 }
 0xde9   :  { %2074 = vsyncpa [#allocation5], 1 }
 0xdea   :  { %2076 = vsyncpa [#allocation5 + $0x1], 1 }

</bundles_post_ra>
